<compile_context>
chip_gen: v5e
topology: v5e:2x2
jax: 0.10.0
libtpu: 0.0.40
codegen_flags: <defaults>
</compile_context>

<pallas_src>
import numpy as np

import jax
import jax.numpy as jnp
from jax.experimental import pallas as pl
from jax.experimental.pallas import tpu as pltpu


def _round_up(v, m):
    return ((v + m - 1) // m) * m


def _trn_kernel(x_ref, w1_ref, b1_ref, w2_ref, b2_ref, o_ref):
    # Fused ReLU -> Linear1 -> ReLU -> Linear2 on one batch tile, all in VMEM.
    # Elementwise work (ReLU, bias adds) stays in f32; operands are cast to
    # bf16 only right before each MXU matmul; accumulation is f32.
    #
    # NOTE: when B is not a multiple of the batch tile, the padded rows of the
    # ragged last x block contain garbage.  Each output row depends only on the
    # same input row, and Pallas masks the store to the real array extent, so
    # valid rows are unaffected.
    x = jnp.maximum(x_ref[...], 0.0).astype(w1_ref.dtype)             # (TB, D)  relu(f32) -> bf16
    h = jnp.dot(x, w1_ref[...], preferred_element_type=jnp.float32)   # (TB, H)  f32 acc (MXU)
    h = jnp.maximum(h + b1_ref[...], 0.0).astype(w2_ref.dtype)        # bias+relu in f32 -> bf16
    y = jnp.dot(h, w2_ref[...], preferred_element_type=jnp.float32)   # (TB, Cp) f32 acc (MXU)
    o_ref[...] = (y + b2_ref[...]).astype(o_ref.dtype)                # lane-dense (TB, 128k) store


def prepare_trn_params(w1, b1, w2, b2):
    """One-time conversion of TRN weights for the Pallas kernel.

    Casts matmul weights to bf16 (native MXU dtype on all generations) and
    zero-pads the class dim up to a multiple of 128 so the kernel's output
    store is an unmasked lane-dense vst.  Call once at model-load time so the
    f32->bf16 conversion traffic is not paid on every forward call.

    w1: (D, 512)  b1: (512,)   (weights stored transposed: (in, out))
    w2: (512, C)  b2: (C,)
    """
    D, H = w1.shape
    assert w2.shape[0] == H
    C = w2.shape[1]
    C_pad = _round_up(C, 128)

    w1_bf = w1.astype(jnp.bfloat16)
    b1_2d = b1.reshape(1, H).astype(jnp.float32)
    if C_pad != C:
        w2_p = jnp.zeros((H, C_pad), jnp.bfloat16).at[:, :C].set(w2.astype(jnp.bfloat16))
        b2_2d = jnp.zeros((1, C_pad), jnp.float32).at[:, :C].set(b2.astype(jnp.float32))
    else:
        w2_p = w2.astype(jnp.bfloat16)
        b2_2d = b2.reshape(1, C).astype(jnp.float32)
    return {"w1": w1_bf, "b1": b1_2d, "w2": w2_p, "b2": b2_2d, "num_class": C}


def _pick_batch_tile(batch, block_b):
    # Round to a multiple of 16 rows (full sublane packing for the bf16 matmul
    # operands), capped at the requested block_b.
    tb = _round_up(min(block_b, max(batch, 1)), 16)
    # v7x has 2 TensorCores per chip: when the batch allows, make sure the
    # "parallel" batch axis has at least two grid tiles so megacore sharding
    # has something to split.  No-op on single-TC v5e/v6e.
    if batch >= 32 and pl.cdiv(batch, tb) < 2:
        tb = _round_up(pl.cdiv(batch, 2), 16)
    return tb


def trn_forward(x, params, *, block_b=512, out_dtype=None):
    """TRN fusion-head forward: Linear2(ReLU(Linear1(ReLU(x.view(B, -1))))).

    x      : (B, num_frames, img_feature_dim) or (B, D), any float dtype.
    params : output of prepare_trn_params().
    Returns (B, num_class) in `out_dtype` (defaults to x.dtype).
    """
    w1, b1, w2, b2 = params["w1"], params["b1"], params["w2"], params["b2"]
    C = params["num_class"]

    B = x.shape[0]
    x2 = x.reshape(B, -1)                       # view(B, num_frames * img_feature_dim)
    D = x2.shape[1]
    H = w1.shape[1]
    C_pad = w2.shape[1]
    assert w1.shape[0] == D, "feature dim mismatch between x and w1"

    if out_dtype is None:
        out_dtype = x.dtype

    TB = _pick_batch_tile(B, block_b)
    n_b = pl.cdiv(B, TB)

    x_bytes = x2.dtype.itemsize
    out_bytes = np.dtype(out_dtype).itemsize
    w_bytes = D * H * 2 + H * 4 + H * C_pad * 2 + C_pad * 4

    # Scoped-VMEM budget: double-buffered x/out tiles + resident weights +
    # headroom for the f32 intermediates; capped at v7x's 64 MiB physical VMEM.
    vmem_need = (2 * TB * D * x_bytes + w_bytes
                 + 2 * TB * C_pad * out_bytes + 2 * TB * max(H, C_pad) * 4)
    vmem_limit = int(min(64 << 20, max(32 << 20, 2 * vmem_need)))

    # Advisory cost so XLA can overlap this small head with surrounding ops
    # when it stays embedded in a larger jitted program.
    cost = pl.CostEstimate(
        flops=2 * B * D * H + 2 * B * H * C_pad,
        transcendentals=0,
        bytes_accessed=B * D * x_bytes + w_bytes + B * C_pad * out_bytes,
    )

    def build_and_call(single_buffer_weights):
        # Resident (constant block index) operands only need one pipeline
        # buffer; the default of 2 doubles their VMEM footprint for no benefit.
        w_kw = {"pipeline_mode": pl.Buffered(1)} if single_buffer_weights else {}
        call = pl.pallas_call(
            _trn_kernel,
            out_shape=jax.ShapeDtypeStruct((B, C_pad), out_dtype),
            grid_spec=pltpu.PrefetchScalarGridSpec(
                num_scalar_prefetch=0,
                grid=(n_b,),
                in_specs=[
                    pl.BlockSpec((TB, D), lambda i: (i, 0)),              # x tile (pipelined)
                    pl.BlockSpec((D, H), lambda i: (0, 0), **w_kw),       # w1: resident
                    pl.BlockSpec((1, H), lambda i: (0, 0), **w_kw),       # b1: resident
                    pl.BlockSpec((H, C_pad), lambda i: (0, 0), **w_kw),   # w2: resident
                    pl.BlockSpec((1, C_pad), lambda i: (0, 0), **w_kw),   # b2: resident
                ],
                out_specs=pl.BlockSpec((TB, C_pad), lambda i: (i, 0)),
            ),
            compiler_params=pltpu.CompilerParams(
                dimension_semantics=("parallel",),   # independent batch tiles
                vmem_limit_bytes=vmem_limit,
            ),
            cost_estimate=cost,
        )
        return call(x2, w1, b1, w2, b2)

    try:
        out = build_and_call(True)
    except Exception:
        # Guard for JAX builds where BlockSpec.pipeline_mode / pl.Buffered is
        # not supported by the TPU grid pipeliner; default double buffering of
        # the resident weights is correctness-equivalent.
        out = build_and_call(False)

    # Only slice when the class dim was actually padded (avoids an extra copy).
    return out if C_pad == C else out[:, :C]


def _reference(x, w1, b1, w2, b2):
    x2 = x.reshape(x.shape[0], -1).astype(jnp.float32)
    h = jnp.maximum(x2, 0.0) @ w1 + b1
    h = jnp.maximum(h, 0.0)
    return h @ w2 + b2


if __name__ == "__main__":
    # Small shapes consistent with the module.
    B = 2
    num_frames = 8
    img_feature_dim = 32
    num_bottleneck = 512
    num_class = 16
    D = num_frames * img_feature_dim

    key = jax.random.PRNGKey(0)
    kx, k1, kb1, k2, kb2 = jax.random.split(key, 5)

    x = jax.random.normal(kx, (B, num_frames, img_feature_dim), dtype=jnp.float32)

    # Deterministic parameter init (nn.Linear-style uniform bounds), weights
    # stored transposed as (in, out).
    lim1 = 1.0 / (D ** 0.5)
    w1 = jax.random.uniform(k1, (D, num_bottleneck), jnp.float32, -lim1, lim1)
    b1 = jax.random.uniform(kb1, (num_bottleneck,), jnp.float32, -lim1, lim1)
    lim2 = 1.0 / (num_bottleneck ** 0.5)
    w2 = jax.random.uniform(k2, (num_bottleneck, num_class), jnp.float32, -lim2, lim2)
    b2 = jax.random.uniform(kb2, (num_class,), jnp.float32, -lim2, lim2)

    # One-time weight conversion (amortized across forward calls).
    params = prepare_trn_params(w1, b1, w2, b2)

    out = trn_forward(x, params)
    out = jax.block_until_ready(out)

    ref = _reference(x, w1, b1, w2, b2)
    assert out.shape == (B, num_class)
    # Tolerance loosened vs pure-f32 because matmul inputs are bf16 (f32 accumulation).
    assert jnp.allclose(out, ref, atol=2e-2, rtol=2e-2), "mismatch vs reference"

    print("KERNEL_OK")
</pallas_src>

<mosaic_0001>
module attributes {stable_mosaic.version = 11 : i64} {
  func.func @_trn_kernel(%arg0: i32, %arg1: memref<16x256xf32, #tpu.memory_space<vmem>>, %arg2: memref<256x512xbf16, #tpu.memory_space<vmem>>, %arg3: memref<1x512xf32, #tpu.memory_space<vmem>>, %arg4: memref<512x128xbf16, #tpu.memory_space<vmem>>, %arg5: memref<1x128xf32, #tpu.memory_space<vmem>>, %arg6: memref<16x128xf32, #tpu.memory_space<vmem>>) attributes {dimension_semantics = [#tpu.dimension_semantics<parallel>], iteration_bounds = array<i64: 1>, scalar_prefetch = 0 : i64, scratch_operands = 0 : i64, tpu.core_type = #tpu.core_type<tc>, window_params = [{transform_indices = @transform_0, window_bounds = array<i64: 16, 256>}, {pipeline_mode = #tpu.pipeline_mode<synchronous>, transform_indices = @transform_1, window_bounds = array<i64: 256, 512>}, {pipeline_mode = #tpu.pipeline_mode<synchronous>, transform_indices = @transform_2, window_bounds = array<i64: 1, 512>}, {pipeline_mode = #tpu.pipeline_mode<synchronous>, transform_indices = @transform_3, window_bounds = array<i64: 512, 128>}, {pipeline_mode = #tpu.pipeline_mode<synchronous>, transform_indices = @transform_4, window_bounds = array<i64: 1, 128>}, {transform_indices = @transform_5, window_bounds = array<i64: 16, 128>}]} {
    %c0 = arith.constant 0 : index
    %c0_0 = arith.constant 0 : index
    %0 = vector.load %arg1[%c0, %c0_0] : memref<16x256xf32, #tpu.memory_space<vmem>>, vector<16x256xf32>
    %cst = arith.constant 0.000000e+00 : f32
    %1 = vector.broadcast %cst : f32 to vector<16x256xf32>
    %2 = arith.maximumf %0, %1 : vector<16x256xf32>
    %3 = arith.truncf %2 : vector<16x256xf32> to vector<16x256xbf16>
    %c0_1 = arith.constant 0 : index
    %c0_2 = arith.constant 0 : index
    %4 = vector.load %arg2[%c0_1, %c0_2] : memref<256x512xbf16, #tpu.memory_space<vmem>>, vector<256x512xbf16>
    %cst_3 = arith.constant dense<0.000000e+00> : vector<16x512xf32>
    %5 = tpu.matmul %3, %4, %cst_3 {dimension_numbers = #tpu.dot_dimension_numbers<[1], [0], [0], [1], [0, 0, 1, 1], [], []>} : vector<16x256xbf16>, vector<256x512xbf16>, vector<16x512xf32> -> vector<16x512xf32>
    %c0_4 = arith.constant 0 : index
    %c0_5 = arith.constant 0 : index
    %6 = vector.load %arg3[%c0_4, %c0_5] : memref<1x512xf32, #tpu.memory_space<vmem>>, vector<1x512xf32>
    %7 = vector.broadcast %6 : vector<1x512xf32> to vector<16x512xf32>
    %8 = arith.addf %5, %7 : vector<16x512xf32>
    %cst_6 = arith.constant 0.000000e+00 : f32
    %9 = vector.broadcast %cst_6 : f32 to vector<16x512xf32>
    %10 = arith.maximumf %8, %9 : vector<16x512xf32>
    %11 = arith.truncf %10 : vector<16x512xf32> to vector<16x512xbf16>
    %c0_7 = arith.constant 0 : index
    %c0_8 = arith.constant 0 : index
    %12 = vector.load %arg4[%c0_7, %c0_8] : memref<512x128xbf16, #tpu.memory_space<vmem>>, vector<512x128xbf16>
    %cst_9 = arith.constant dense<0.000000e+00> : vector<16x128xf32>
    %13 = tpu.matmul %11, %12, %cst_9 {dimension_numbers = #tpu.dot_dimension_numbers<[1], [0], [0], [1], [0, 0, 1, 1], [], []>} : vector<16x512xbf16>, vector<512x128xbf16>, vector<16x128xf32> -> vector<16x128xf32>
    %c0_10 = arith.constant 0 : index
    %c0_11 = arith.constant 0 : index
    %14 = vector.load %arg5[%c0_10, %c0_11] : memref<1x128xf32, #tpu.memory_space<vmem>>, vector<1x128xf32>
    %15 = vector.broadcast %14 : vector<1x128xf32> to vector<16x128xf32>
    %16 = arith.addf %13, %15 : vector<16x128xf32>
    %c0_12 = arith.constant 0 : index
    %c0_13 = arith.constant 0 : index
    %17 = vector.load %arg6[%c0_12, %c0_13] : memref<16x128xf32, #tpu.memory_space<vmem>>, vector<16x128xf32>
    tpu.vector_store %arg6[%c0_12, %c0_13], %16 {strides = array<i32>} : memref<16x128xf32, #tpu.memory_space<vmem>>, vector<16x128xf32>,
    return
  }
  func.func @transform_0(%arg0: i32) -> (i32, i32) {
    %c0_i32 = arith.constant 0 : i32
    %c0_i32_0 = arith.constant 0 : i32
    return %arg0, %c0_i32 : i32, i32
  }
  func.func @transform_1(%arg0: i32) -> (i32, i32) {
    %c0_i32 = arith.constant 0 : i32
    %c0_i32_0 = arith.constant 0 : i32
    %c0_i32_1 = arith.constant 0 : i32
    return %c0_i32, %c0_i32_0 : i32, i32
  }
  func.func @transform_2(%arg0: i32) -> (i32, i32) {
    %c0_i32 = arith.constant 0 : i32
    %c0_i32_0 = arith.constant 0 : i32
    %c0_i32_1 = arith.constant 0 : i32
    return %c0_i32, %c0_i32_0 : i32, i32
  }
  func.func @transform_3(%arg0: i32) -> (i32, i32) {
    %c0_i32 = arith.constant 0 : i32
    %c0_i32_0 = arith.constant 0 : i32
    %c0_i32_1 = arith.constant 0 : i32
    return %c0_i32, %c0_i32_0 : i32, i32
  }
  func.func @transform_4(%arg0: i32) -> (i32, i32) {
    %c0_i32 = arith.constant 0 : i32
    %c0_i32_0 = arith.constant 0 : i32
    %c0_i32_1 = arith.constant 0 : i32
    return %c0_i32, %c0_i32_0 : i32, i32
  }
  func.func @transform_5(%arg0: i32) -> (i32, i32) {
    %c0_i32 = arith.constant 0 : i32
    %c0_i32_0 = arith.constant 0 : i32
    return %arg0, %c0_i32 : i32, i32
  }
}

module attributes {stable_mosaic.version = 11 : i64} {
  func.func @_trn_kernel(%arg0: i32, %arg1: memref<16x256xf32, #tpu.memory_space<vmem>>, %arg2: memref<256x512xbf16, #tpu.memory_space<vmem>>, %arg3: memref<1x512xf32, #tpu.memory_space<vmem>>, %arg4: memref<512x128xbf16, #tpu.memory_space<vmem>>, %arg5: memref<1x128xf32, #tpu.memory_space<vmem>>, %arg6: memref<16x128xf32, #tpu.memory_space<vmem>>) attributes {dimension_semantics = [#tpu.dimension_semantics<parallel>], iteration_bounds = array<i64: 1>, scalar_prefetch = 0 : i64, scratch_operands = 0 : i64, tpu.core_type = #tpu.core_type<tc>, window_params = [{transform_indices = @transform_0, window_bounds = array<i64: 16, 256>}, {pipeline_mode = #tpu.pipeline_mode<synchronous>, transform_indices = @transform_1, window_bounds = array<i64: 256, 512>}, {pipeline_mode = #tpu.pipeline_mode<synchronous>, transform_indices = @transform_2, window_bounds = array<i64: 1, 512>}, {pipeline_mode = #tpu.pipeline_mode<synchronous>, transform_indices = @transform_3, window_bounds = array<i64: 512, 128>}, {pipeline_mode = #tpu.pipeline_mode<synchronous>, transform_indices = @transform_4, window_bounds = array<i64: 1, 128>}, {transform_indices = @transform_5, window_bounds = array<i64: 16, 128>}]} {
    %c0 = arith.constant 0 : index
    %c0_0 = arith.constant 0 : index
    %0 = vector.load %arg1[%c0, %c0_0] : memref<16x256xf32, #tpu.memory_space<vmem>>, vector<16x256xf32>
    %cst = arith.constant 0.000000e+00 : f32
    %1 = vector.broadcast %cst : f32 to vector<16x256xf32>
    %2 = arith.maximumf %0, %1 : vector<16x256xf32>
    %3 = arith.truncf %2 : vector<16x256xf32> to vector<16x256xbf16>
    %c0_1 = arith.constant 0 : index
    %c0_2 = arith.constant 0 : index
    %4 = vector.load %arg2[%c0_1, %c0_2] : memref<256x512xbf16, #tpu.memory_space<vmem>>, vector<256x512xbf16>
    %cst_3 = arith.constant dense<0.000000e+00> : vector<16x512xf32>
    %5 = tpu.matmul %3, %4, %cst_3 {dimension_numbers = #tpu.dot_dimension_numbers<[1], [0], [0], [1], [0, 0, 1, 1], [], []>} : vector<16x256xbf16>, vector<256x512xbf16>, vector<16x512xf32> -> vector<16x512xf32>
    %c0_4 = arith.constant 0 : index
    %c0_5 = arith.constant 0 : index
    %6 = vector.load %arg3[%c0_4, %c0_5] : memref<1x512xf32, #tpu.memory_space<vmem>>, vector<1x512xf32>
    %7 = vector.broadcast %6 : vector<1x512xf32> to vector<16x512xf32>
    %8 = arith.addf %5, %7 : vector<16x512xf32>
    %cst_6 = arith.constant 0.000000e+00 : f32
    %9 = vector.broadcast %cst_6 : f32 to vector<16x512xf32>
    %10 = arith.maximumf %8, %9 : vector<16x512xf32>
    %11 = arith.truncf %10 : vector<16x512xf32> to vector<16x512xbf16>
    %c0_7 = arith.constant 0 : index
    %c0_8 = arith.constant 0 : index
    %12 = vector.load %arg4[%c0_7, %c0_8] : memref<512x128xbf16, #tpu.memory_space<vmem>>, vector<512x128xbf16>
    %cst_9 = arith.constant dense<0.000000e+00> : vector<16x128xf32>
    %13 = tpu.matmul %11, %12, %cst_9 {dimension_numbers = #tpu.dot_dimension_numbers<[1], [0], [0], [1], [0, 0, 1, 1], [], []>} : vector<16x512xbf16>, vector<512x128xbf16>, vector<16x128xf32> -> vector<16x128xf32>
    %c0_10 = arith.constant 0 : index
    %c0_11 = arith.constant 0 : index
    %14 = vector.load %arg5[%c0_10, %c0_11] : memref<1x128xf32, #tpu.memory_space<vmem>>, vector<1x128xf32>
    %15 = vector.broadcast %14 : vector<1x128xf32> to vector<16x128xf32>
    %16 = arith.addf %13, %15 : vector<16x128xf32>
    %c0_12 = arith.constant 0 : index
    %c0_13 = arith.constant 0 : index
    %17 = vector.load %arg6[%c0_12, %c0_13] : memref<16x128xf32, #tpu.memory_space<vmem>>, vector<16x128xf32>
    tpu.vector_store %arg6[%c0_12, %c0_13], %16 {strides = array<i32>} : memref<16x128xf32, #tpu.memory_space<vmem>>, vector<16x128xf32>,
    return
  }
  func.func @transform_0(%arg0: i32) -> (i32, i32) {
    %c0_i32 = arith.constant 0 : i32
    %c0_i32_0 = arith.constant 0 : i32
    return %arg0, %c0_i32 : i32, i32
  }
  func.func @transform_1(%arg0: i32) -> (i32, i32) {
    %c0_i32 = arith.constant 0 : i32
    %c0_i32_0 = arith.constant 0 : i32
    %c0_i32_1 = arith.constant 0 : i32
    return %c0_i32, %c0_i32_0 : i32, i32
  }
  func.func @transform_2(%arg0: i32) -> (i32, i32) {
    %c0_i32 = arith.constant 0 : i32
    %c0_i32_0 = arith.constant 0 : i32
    %c0_i32_1 = arith.constant 0 : i32
    return %c0_i32, %c0_i32_0 : i32, i32
  }
  func.func @transform_3(%arg0: i32) -> (i32, i32) {
    %c0_i32 = arith.constant 0 : i32
    %c0_i32_0 = arith.constant 0 : i32
    %c0_i32_1 = arith.constant 0 : i32
    return %c0_i32, %c0_i32_0 : i32, i32
  }
  func.func @transform_4(%arg0: i32) -> (i32, i32) {
    %c0_i32 = arith.constant 0 : i32
    %c0_i32_0 = arith.constant 0 : i32
    %c0_i32_1 = arith.constant 0 : i32
    return %c0_i32, %c0_i32_0 : i32, i32
  }
  func.func @transform_5(%arg0: i32) -> (i32, i32) {
    %c0_i32 = arith.constant 0 : i32
    %c0_i32_0 = arith.constant 0 : i32
    return %arg0, %c0_i32 : i32, i32
  }
}

</mosaic_0001>

<bundles_post_ra>
// kernel: tpu_custom_call.1
= control target key start
LH: loop header
LB: loop body
LE: loop exit
PB: predicated region body
PF: predicated region fallthrough
CT: control target
= control target key end

     0   :  { %10 = vsyncpa [#allocation3], 0  ;;  %s1685_s0 = inlined_call_operand.hbm [shape: f32[2,256], index: 0, kind: input, shape index: {}]   ;;  %s1686_s1 = inlined_call_operand.hbm [shape: bf16[256,512], index: 1, kind: input, shape index: {}]   ;;  %s1687_s2 = inlined_call_operand.hbm [shape: f32[1,512], index: 2, kind: input, shape index: {}]   ;;  %s1688_s3 = inlined_call_operand.hbm [shape: bf16[512,128], index: 3, kind: input, shape index: {}]   ;;  %s1689_s4 = inlined_call_operand.vmem [shape: f32[1,128], index: 4, kind: input, shape index: {}]   ;;  %s1690_s5 = inlined_call_operand.hbm [shape: f32[2,128], index: 5, kind: output, shape index: {}]  }
   0x1   :  { %11 = vsyncpa [#allocation6], 0 }
   0x2   :  { %12 = vsyncpa [#allocation9], 0 }
   0x3   :  { %13 = vsyncpa [#allocation4], 0  ;;  %s31_s20 = sshll.u32 %s1686_s1, 4  ;;  %s32_s20 = int_to_ptr.hbm [resolvable:$true] %s31_s20 }
   0x4   :  { %17 = vsyncadd [#allocation3], 448  ;;  %s1608_s21 = smov [#allocation5]   ;;  %s18_s25 = sshll.u32 %s1685_s0, 4  ;;  %s19_s25 = int_to_ptr.hbm [resolvable:$true] %s18_s25 }
   0x5   :  { %s33_s22 = sshll.u32 %s1608_s21, 4  ;;  %s1609_s26 = smov 256   ;;  %s34_s22 = int_to_ptr.vmem [resolvable:$true] %s33_s22 }
   0x6   :  { %s1610_s27 = smov 16   ;;  %s1611_s28 = smov [#allocation2]  }
   0x7   :  { %39 = dma.hbm_to_vmem [thread:$0]  %s32_s20, 8192, %s34_s22, [#allocation6], %s1609_s26, %s1609_s26, %s1610_s27  }
   0x8   :  { %s20_s29 = sshll.u32 %s1611_s28, 4  ;;  %s1612_s30 = smov 64   ;;  %s21_s29 = int_to_ptr.vmem [resolvable:$true] %s20_s29 }
   0x9   :  { %s1613_s6 = smov 4   ;;  %s45_s8 = sshll.u32 %s1687_s2, 4  ;;  %s46_s8 = int_to_ptr.hbm [resolvable:$true] %s45_s8 }
   0xa   :  { %26 = dma.hbm_to_vmem [thread:$0]  %s19_s25, 64, %s21_s29, [#allocation3], %s1612_s30, %s1612_s30, %s1613_s6  }
   0xb   :  { %s1614_s9 = smov [#allocation7]   ;;  %s55_s12 = sshll.u32 %s1688_s3, 4  ;;  %s56_s12 = int_to_ptr.hbm [resolvable:$true] %s55_s12 }
   0xc   :  { %s47_s10 = sshll.u32 %s1614_s9, 4  ;;  %s1615_s13 = smov [#allocation8]   ;;  %s48_s10 = int_to_ptr.vmem [resolvable:$true] %s47_s10 }
   0xd   :  { %50 = dma.hbm_to_vmem [thread:$0]  %s46_s8, 64, %s48_s10, [#allocation6]  }
   0xe   :  { %s57_s14 = sshll.u32 %s1615_s13, 4  ;;  %s58_s14 = int_to_ptr.vmem [resolvable:$true] %s57_s14 }
   0xf   :  { %63 = dma.hbm_to_vmem [thread:$0]  %s56_s12, 4096, %s58_s14, [#allocation9], %s1612_s30, %s1612_s30, %s1613_s6  }
  0x10   :  { %1600 = dma.done.wait [#allocation3], 512  }
  0x11   :  { %1601 = vsyncadd [#allocation3], 4294966784 }
  0x12   :  { %1602 = dma.done.wait [#allocation6], 8256  }
  0x13   :  { %1603 = vsyncadd [#allocation6], 4294959040 }
  0x14   :  { %1604 = dma.done.wait [#allocation9], 4096  }
  0x15   :  { %1605 = vsyncadd [#allocation9], 4294963200  ;;  %v1102_v0 = vld [vmem:[#allocation5 + $0xe0] sm:$0xf]  ;;  %v1402_v1 = vld [vmem:[#allocation5 + $0xec] sm:$0xf0] }
  0x16   :  { %v1230_v2 = vld [vmem:[#allocation5 + $0x1e0] sm:$0xf]  ;;  %v1103_v3 = vor.u32 %v1402_v1, %v1102_v0  ;;  %v1434_v4 = vld [vmem:[#allocation5 + $0x1ec] sm:$0xf0]  ;;  %v1400_v5 = vld [vmem:[#allocation5 + $0xe4] sm:$0xf] }
  0x17   :  { %v1104_v6 = vld [vmem:[#allocation5 + $0xf0] sm:$0xf0]  ;;  %v1231_v7 = vor.u32 %v1434_v4, %v1230_v2  ;;  %v1432_v9 = vld [vmem:[#allocation5 + $0x1e4] sm:$0xf]  ;;  %v1086_v11 = vld [vmem:[#allocation5 + $0xc0] sm:$0xf] }
  0x18   :  { %v1107_v8 = vor.u32 %v1400_v5, %v1104_v6  ;;  %v1232_v10 = vld [vmem:[#allocation5 + $0x1f0] sm:$0xf0]  ;;  %525 = vmatpush.bf16.msra.mxu0 %v1103_v3  ;;  %v1398_v13 = vld [vmem:[#allocation5 + $0xcc] sm:$0xf0]  ;;  %v1214_v14 = vld [vmem:[#allocation5 + $0x1c0] sm:$0xf] }
  0x19   :  { %v1235_v12 = vor.u32 %v1432_v9, %v1232_v10  ;;  %v1430_v15 = vld [vmem:[#allocation5 + $0x1cc] sm:$0xf0]  ;;  %539 = vmatpush.bf16.msra.mxu1 %v1231_v7  ;;  %v1087_v16 = vor.u32 %v1398_v13, %v1086_v11  ;;  %v1396_v18 = vld [vmem:[#allocation5 + $0xc4] sm:$0xf]  ;;  %v1088_v19 = vld [vmem:[#allocation5 + $0xd0] sm:$0xf0] }
  0x1a   :  { %553 = vmatpush.bf16.msra.mxu2 %v1107_v8  ;;  %v1215_v17 = vor.u32 %v1430_v15, %v1214_v14  ;;  %v1428_v20 = vld [vmem:[#allocation5 + $0x1c4] sm:$0xf]  ;;  %v1091_v21 = vor.u32 %v1396_v18, %v1088_v19  ;;  %v1216_v22 = vld [vmem:[#allocation5 + $0x1d0] sm:$0xf0]  ;;  %v1070_v23 = vld [vmem:[#allocation5 + $0xa0] sm:$0xf] }
  0x1b   :  { %567 = vmatpush.bf16.msra.mxu3 %v1235_v12  ;;  %v1394_v24 = vld [vmem:[#allocation5 + $0xac] sm:$0xf0]  ;;  %v1219_v25 = vor.u32 %v1428_v20, %v1216_v22  ;;  %v1198_v26 = vld [vmem:[#allocation5 + $0x1a0] sm:$0xf]  ;;  %v1392_v28 = vld [vmem:[#allocation5 + $0xa4] sm:$0xf] }
  0x1c   :  { %v1426_v27 = vld [vmem:[#allocation5 + $0x1ac] sm:$0xf0]  ;;  %526 = vmatpush.bf16.msra.mxu0 %v1087_v16  ;;  %v1071_v29 = vor.u32 %v1394_v24, %v1070_v23  ;;  %v1072_v30 = vld [vmem:[#allocation5 + $0xb0] sm:$0xf0]  ;;  %v1424_v31 = vld [vmem:[#allocation5 + $0x1a4] sm:$0xf] }
  0x1d   :  { %v1200_v32 = vld [vmem:[#allocation5 + $0x1b0] sm:$0xf0]  ;;  %540 = vmatpush.bf16.msra.mxu1 %v1215_v17  ;;  %v1199_v33 = vor.u32 %v1426_v27, %v1198_v26  ;;  %v1075_v34 = vor.u32 %v1392_v28, %v1072_v30  ;;  %v1054_v35 = vld [vmem:[#allocation5 + $0x80] sm:$0xf]  ;;  %v1390_v36 = vld [vmem:[#allocation5 + $0x8c] sm:$0xf0] }
  0x1e   :  { %554 = vmatpush.bf16.msra.mxu2 %v1091_v21  ;;  %v1182_v37 = vld [vmem:[#allocation5 + $0x180] sm:$0xf]  ;;  %v1203_v38 = vor.u32 %v1424_v31, %v1200_v32  ;;  %v1422_v39 = vld [vmem:[#allocation5 + $0x18c] sm:$0xf0]  ;;  %v1388_v40 = vld [vmem:[#allocation5 + $0x84] sm:$0xf]  ;;  %v1055_v44 = vor.u32 %v1390_v36, %v1054_v35 }
  0x1f   :  { %568 = vmatpush.bf16.msra.mxu3 %v1219_v25  ;;  %v1056_v41 = vld [vmem:[#allocation5 + $0x90] sm:$0xf0]  ;;  %v1420_v42 = vld [vmem:[#allocation5 + $0x184] sm:$0xf]  ;;  %v1183_v45 = vor.u32 %v1422_v39, %v1182_v37  ;;  %v1038_v47 = vld [vmem:[#allocation5 + $0x60] sm:$0xf] }
  0x20   :  { %v1184_v43 = vld [vmem:[#allocation5 + $0x190] sm:$0xf0]  ;;  %527 = vmatpush.bf16.msra.mxu0 %v1071_v29  ;;  %v1059_v46 = vor.u32 %v1388_v40, %v1056_v41  ;;  %v1386_v48 = vld [vmem:[#allocation5 + $0x6c] sm:$0xf0]  ;;  %v1166_v49 = vld [vmem:[#allocation5 + $0x160] sm:$0xf] }
  0x21   :  { %541 = vmatpush.bf16.msra.mxu1 %v1199_v33  ;;  %v1187_v50 = vor.u32 %v1420_v42, %v1184_v43  ;;  %v1418_v51 = vld [vmem:[#allocation5 + $0x16c] sm:$0xf0]  ;;  %v1384_v52 = vld [vmem:[#allocation5 + $0x64] sm:$0xf]  ;;  %v1040_v53 = vld [vmem:[#allocation5 + $0x70] sm:$0xf0]  ;;  %v1039_v56 = vor.u32 %v1386_v48, %v1038_v47 }
  0x22   :  { %555 = vmatpush.bf16.msra.mxu2 %v1075_v34  ;;  %v1416_v54 = vld [vmem:[#allocation5 + $0x164] sm:$0xf]  ;;  %v1168_v55 = vld [vmem:[#allocation5 + $0x170] sm:$0xf0]  ;;  %v1167_v57 = vor.u32 %v1418_v51, %v1166_v49  ;;  %v1043_v58 = vor.u32 %v1384_v52, %v1040_v53  ;;  %v1022_v59 = vld [vmem:[#allocation5 + $0x40] sm:$0xf] }
  0x23   :  { %569 = vmatpush.bf16.msra.mxu3 %v1203_v38  ;;  %v1382_v60 = vld [vmem:[#allocation5 + $0x4c] sm:$0xf0]  ;;  %v1150_v61 = vld [vmem:[#allocation5 + $0x140] sm:$0xf]  ;;  %v1171_v62 = vor.u32 %v1416_v54, %v1168_v55  ;;  %v1380_v0 = vld [vmem:[#allocation5 + $0x44] sm:$0xf] }
  0x24   :  { %528 = vmatpush.bf16.msra.mxu0 %v1055_v44  ;;  %v1414_v63 = vld [vmem:[#allocation5 + $0x14c] sm:$0xf0]  ;;  %v1024_v1 = vld [vmem:[#allocation5 + $0x50] sm:$0xf0]  ;;  %v1412_v2 = vld [vmem:[#allocation5 + $0x144] sm:$0xf]  ;;  %v1023_v4 = vor.u32 %v1382_v60, %v1022_v59 }
  0x25   :  { %542 = vmatpush.bf16.msra.mxu1 %v1183_v45  ;;  %v1152_v3 = vld [vmem:[#allocation5 + $0x150] sm:$0xf0]  ;;  %v1006_v5 = vld [vmem:[#allocation5 + $0x20] sm:$0xf]  ;;  %v1151_v6 = vor.u32 %v1414_v63, %v1150_v61  ;;  %v1027_v7 = vor.u32 %v1380_v0, %v1024_v1  ;;  %v1378_v8 = vld [vmem:[#allocation5 + $0x2c] sm:$0xf0] }
  0x26   :  { %556 = vmatpush.bf16.msra.mxu2 %v1059_v46  ;;  %v1134_v9 = vld [vmem:[#allocation5 + $0x120] sm:$0xf]  ;;  %v1410_v10 = vld [vmem:[#allocation5 + $0x12c] sm:$0xf0]  ;;  %v1155_v11 = vor.u32 %v1412_v2, %v1152_v3  ;;  %v1376_v12 = vld [vmem:[#allocation5 + $0x24] sm:$0xf]  ;;  %v1007_v18 = vor.u32 %v1378_v8, %v1006_v5 }
  0x27   :  { %570 = vmatpush.bf16.msra.mxu3 %v1187_v50  ;;  %v1008_v13 = vld [vmem:[#allocation5 + $0x30] sm:$0xf0]  ;;  %v1408_v14 = vld [vmem:[#allocation5 + $0x124] sm:$0xf]  ;;  %v990_v16 = vld [vmem:[#allocation5] sm:$0xf]  ;;  %v1135_v23 = vor.u32 %v1410_v10, %v1134_v9 }
  0x28   :  { %529 = vmatpush.bf16.msra.mxu0 %v1039_v56  ;;  %v1136_v15 = vld [vmem:[#allocation5 + $0x130] sm:$0xf0]  ;;  %v1374_v17 = vld [vmem:[#allocation5 + $0xc] sm:$0xf0]  ;;  %v1118_v19 = vld [vmem:[#allocation5 + $0x100] sm:$0xf]  ;;  %v1011_v24 = vor.u32 %v1376_v12, %v1008_v13 }
  0x29   :  { %543 = vmatpush.bf16.msra.mxu1 %v1167_v57  ;;  %v1406_v20 = vld [vmem:[#allocation5 + $0x10c] sm:$0xf0]  ;;  %v1372_v21 = vld [vmem:[#allocation5 + $0x4] sm:$0xf]  ;;  %v992_v22 = vld [vmem:[#allocation5 + $0x10] sm:$0xf0]  ;;  %v1139_v32 = vor.u32 %v1408_v14, %v1136_v15  ;;  %v991_v44 = vor.u32 %v1374_v17, %v990_v16 }
  0x2a   :  { %557 = vmatpush.bf16.msra.mxu2 %v1043_v58  ;;  %v1404_v25 = vld [vmem:[#allocation5 + $0x104] sm:$0xf]  ;;  %v1120_v26 = vld [vmem:[#allocation5 + $0x110] sm:$0xf0]  ;;  %v1110_v27 = vld [vmem:[#allocation5 + $0xe8] sm:$0xf]  ;;  %v1119_v49 = vor.u32 %v1406_v20, %v1118_v19  ;;  %v995_v50 = vor.u32 %v1372_v21, %v992_v22 }
  0x2b   :  { %571 = vmatpush.bf16.msra.mxu3 %v1171_v62  ;;  %v1403_v28 = vld [vmem:[#allocation5 + $0xf4] sm:$0xf0]  ;;  %v82_v29 = vld [vmem:[#allocation2] sm:$0xf]  ;;  %v83_v30 = vld [vmem:[#allocation2 + $0x4] sm:$0xf]  ;;  %v1123_v54 = vor.u32 %v1404_v25, %v1120_v26 }
  0x2c   :  { %530 = vmatpush.bf16.msra.mxu0 %v1023_v4  ;;  %v84_v31 = vld [vmem:[#allocation2 + $0x8] sm:$0xf]  ;;  %v1435_v34 = vld [vmem:[#allocation5 + $0x1f4] sm:$0xf0]  ;;  %v1401_v35 = vld [vmem:[#allocation5 + $0xec] sm:$0xf]  ;;  %v1111_v55 = vor.u32 %v1403_v28, %v1110_v27 }
  0x2d   :  { %544 = vmatpush.bf16.msra.mxu1 %v1151_v6  ;;  %v1238_v33 = vld [vmem:[#allocation5 + $0x1e8] sm:$0xf]  ;;  %v1112_v36 = vld [vmem:[#allocation5 + $0xf8] sm:$0xf0]  ;;  %v85_v37 = vld [vmem:[#allocation2 + $0xc] sm:$0xf] }
  0x2e   :  { %558 = vmatpush.bf16.msra.mxu2 %v1027_v7  ;;  %v86_v38 = vld [vmem:[#allocation2 + $0x10] sm:$0xf]  ;;  %v87_v39 = vld [vmem:[#allocation2 + $0x14] sm:$0xf]  ;;  %v88_v40 = vld [vmem:[#allocation2 + $0x18] sm:$0xf]  ;;  %v1239_v59 = vor.u32 %v1435_v34, %v1238_v33  ;;  %v1115_v60 = vor.u32 %v1401_v35, %v1112_v36 }
  0x2f   :  { %572 = vmatpush.bf16.msra.mxu3 %v1155_v11  ;;  %v89_v41 = vld [vmem:[#allocation2 + $0x1c] sm:$0xf]  ;;  %v90_v42 = vmax.f32 %v82_v29, 0.0  ;;  %v91_v43 = vmax.f32 %v83_v30, 0.0  ;;  %v1433_v45 = vld [vmem:[#allocation5 + $0x1ec] sm:$0xf] }
  0x30   :  { %531 = vmatpush.bf16.msra.mxu0 %v1007_v18  ;;  %v1240_v46 = vld [vmem:[#allocation5 + $0x1f8] sm:$0xf0]  ;;  %v92_v47 = vmax.f32 %v84_v31, 0.0  ;;  %v93_v48 = vmax.f32 %v85_v37, 0.0  ;;  %v94_v51 = vmax.f32 %v86_v38, 0.0  ;;  %v95_v52 = vmax.f32 %v87_v39, 0.0 }
  0x31   :  { %545 = vmatpush.bf16.msra.mxu1 %v1135_v23  ;;  %106 = vst [vmem:[#allocation1] ss:$4 sm:$0xff] %v90_v42  ;;  %v1094_v53 = vld [vmem:[#allocation5 + $0xc8] sm:$0xf]  ;;  %v96_v56 = vmax.f32 %v88_v40, 0.0  ;;  %v97_v57 = vmax.f32 %v89_v41, 0.0  ;;  %v1243_v63 = vor.u32 %v1433_v45, %v1240_v46 }
  0x32   :  { %559 = vmatpush.bf16.msra.mxu2 %v1011_v24  ;;  %108 = vst [vmem:[#allocation1 + $0x1] ss:$4 sm:$0xff] %v91_v43  ;;  %v1399_v58 = vld [vmem:[#allocation5 + $0xd4] sm:$0xf0]  ;;  %v1222_v61 = vld [vmem:[#allocation5 + $0x1c8] sm:$0xf] }
  0x33   :  { %573 = vmatpush.bf16.msra.mxu3 %v1139_v32  ;;  %110 = vst [vmem:[#allocation1 + $0x2] ss:$4 sm:$0xff] %v92_v47  ;;  %v1431_v62 = vld [vmem:[#allocation5 + $0x1d4] sm:$0xf0]  ;;  %v1397_v0 = vld [vmem:[#allocation5 + $0xcc] sm:$0xf]  ;;  %v1095_v4 = vor.u32 %v1399_v58, %v1094_v53 }
  0x34   :  { %532 = vmatpush.bf16.msra.mxu0 %v991_v44  ;;  %112 = vst [vmem:[#allocation1 + $0x3] ss:$4 sm:$0xff] %v93_v48  ;;  %v1096_v1 = vld [vmem:[#allocation5 + $0xd8] sm:$0xf0]  ;;  %v1429_v2 = vld [vmem:[#allocation5 + $0x1cc] sm:$0xf]  ;;  %v1223_v7 = vor.u32 %v1431_v62, %v1222_v61 }
  0x35   :  { %546 = vmatpush.bf16.msra.mxu1 %v1119_v49  ;;  %114 = vst [vmem:[#allocation1 + $0x20] ss:$4 sm:$0xff] %v94_v51  ;;  %v1224_v3 = vld [vmem:[#allocation5 + $0x1d8] sm:$0xf0]  ;;  %v1078_v5 = vld [vmem:[#allocation5 + $0xa8] sm:$0xf]  ;;  %v1099_v8 = vor.u32 %v1397_v0, %v1096_v1 }
  0x36   :  { %560 = vmatpush.bf16.msra.mxu2 %v995_v50  ;;  %116 = vst [vmem:[#allocation1 + $0x21] ss:$4 sm:$0xff] %v95_v52  ;;  %v1395_v6 = vld [vmem:[#allocation5 + $0xb4] sm:$0xf0]  ;;  %v1206_v9 = vld [vmem:[#allocation5 + $0x1a8] sm:$0xf]  ;;  %v1227_v11 = vor.u32 %v1429_v2, %v1224_v3 }
  0x37   :  { %574 = vmatpush.bf16.msra.mxu3 %v1123_v54  ;;  %118 = vst [vmem:[#allocation1 + $0x22] ss:$4 sm:$0xff] %v96_v56  ;;  %v1427_v10 = vld [vmem:[#allocation5 + $0x1b4] sm:$0xf0]  ;;  %v1393_v12 = vld [vmem:[#allocation5 + $0xac] sm:$0xf]  ;;  %v1079_v16 = vor.u32 %v1395_v6, %v1078_v5 }
  0x38   :  { %581 = vmatpush.bf16.msrb.mxu0 %v1111_v55  ;;  %120 = vst [vmem:[#allocation1 + $0x23] ss:$4 sm:$0xff] %v97_v57  ;;  %v1080_v13 = vld [vmem:[#allocation5 + $0xb8] sm:$0xf0]  ;;  %v1425_v14 = vld [vmem:[#allocation5 + $0x1ac] sm:$0xf]  ;;  %v1207_v17 = vor.u32 %v1427_v10, %v1206_v9 }
  0x39   :  { %595 = vmatpush.bf16.msrb.mxu1 %v1239_v59  ;;  %v1208_v15 = vld [vmem:[#allocation5 + $0x1b8] sm:$0xf0]  ;;  %v1083_v18 = vor.u32 %v1393_v12, %v1080_v13  ;;  %v1062_v19 = vld [vmem:[#allocation5 + $0x88] sm:$0xf]  ;;  %v1391_v20 = vld [vmem:[#allocation5 + $0x94] sm:$0xf0] }
  0x3a   :  { %609 = vmatpush.bf16.msrb.mxu2 %v1115_v60  ;;  %v1211_v21 = vor.u32 %v1425_v14, %v1208_v15  ;;  %v1190_v22 = vld [vmem:[#allocation5 + $0x188] sm:$0xf]  ;;  %v1423_v23 = vld [vmem:[#allocation5 + $0x194] sm:$0xf0]  ;;  %v1389_v24 = vld [vmem:[#allocation5 + $0x8c] sm:$0xf]  ;;  %v1063_v34 = vor.u32 %v1391_v20, %v1062_v19 }
  0x3b   :  { %623 = vmatpush.bf16.msrb.mxu3 %v1243_v63  ;;  %v121_v25 = vld.sshfl [vmem:[#allocation1] sm:$0xff pattern:$0x73625140]  ;;  %v122_v26 = vld.sshfl [vmem:[#allocation1 + $0x8] sm:$0xff pattern:$0x73625140]  ;;  %v1191_v35 = vor.u32 %v1423_v23, %v1190_v22 }
  0x3c   :  { %582 = vmatpush.bf16.msrb.mxu0 %v1095_v4  ;;  %v1064_v27 = vld [vmem:[#allocation5 + $0x98] sm:$0xf0]  ;;  %v1421_v28 = vld [vmem:[#allocation5 + $0x18c] sm:$0xf]  ;;  %v1046_v36 = vld [vmem:[#allocation5 + $0x68] sm:$0xf] }
  0x3d   :  { %596 = vmatpush.bf16.msrb.mxu1 %v1223_v7  ;;  %v1192_v29 = vld [vmem:[#allocation5 + $0x198] sm:$0xf0]  ;;  %v1387_v37 = vld [vmem:[#allocation5 + $0x74] sm:$0xf0]  ;;  %v1067_v38 = vor.u32 %v1389_v24, %v1064_v27  ;;  %v1174_v40 = vld [vmem:[#allocation5 + $0x168] sm:$0xf] }
  0x3e   :  { %610 = vmatpush.bf16.msrb.mxu2 %v1099_v8  ;;  %v1195_v39 = vor.u32 %v1421_v28, %v1192_v29  ;;  %v1419_v41 = vld [vmem:[#allocation5 + $0x174] sm:$0xf0]  ;;  %v1385_v42 = vld [vmem:[#allocation5 + $0x6c] sm:$0xf]  ;;  %v1048_v43 = vld [vmem:[#allocation5 + $0x78] sm:$0xf0]  ;;  %v1047_v46 = vor.u32 %v1387_v37, %v1046_v36 }
  0x3f   :  { %624 = vmatpush.bf16.msrb.mxu3 %v1227_v11  ;;  %v123_v30 = vld.sshfl [vmem:[#allocation1 + $0x20] sm:$0xff pattern:$0x73625140]  ;;  %v124_v31 = vld.sshfl [vmem:[#allocation1 + $0x28] sm:$0xff pattern:$0x73625140]  ;;  %v1175_v47 = vor.u32 %v1419_v41, %v1174_v40  ;;  %v1051_v50 = vor.u32 %v1385_v42, %v1048_v43 }
  0x40   :  { %583 = vmatpush.bf16.msrb.mxu0 %v1079_v16  ;;  %v1661_v32 = vpack.c.bf16 %v123_v30, %v121_v25  ;;  %v1663_v33 = vpack.c.bf16 %v124_v31, %v122_v26  ;;  %v1417_v44 = vld [vmem:[#allocation5 + $0x16c] sm:$0xf]  ;;  %v1176_v45 = vld [vmem:[#allocation5 + $0x178] sm:$0xf0]  ;;  %v1030_v48 = vld [vmem:[#allocation5 + $0x48] sm:$0xf] }
  0x41   :  { %597 = vmatpush.bf16.msrb.mxu1 %v1207_v17  ;;  %v1383_v49 = vld [vmem:[#allocation5 + $0x54] sm:$0xf0]  ;;  %v1179_v51 = vor.u32 %v1417_v44, %v1176_v45  ;;  %v1158_v52 = vld [vmem:[#allocation5 + $0x148] sm:$0xf]  ;;  %v1381_v54 = vld [vmem:[#allocation5 + $0x4c] sm:$0xf] }
  0x42   :  { %611 = vmatpush.bf16.msrb.mxu2 %v1083_v18  ;;  %533 = vmatmul.bf16.vlgmr.msra.gmra.mxu0 %v1661_v32  ;;  %v1415_v53 = vld [vmem:[#allocation5 + $0x154] sm:$0xf0]  ;;  %v1032_v55 = vld [vmem:[#allocation5 + $0x58] sm:$0xf0]  ;;  %v1413_v56 = vld [vmem:[#allocation5 + $0x14c] sm:$0xf]  ;;  %v1031_v58 = vor.u32 %v1383_v49, %v1030_v48 }
  0x43   :  { %625 = vmatpush.bf16.msrb.mxu3 %v1211_v21  ;;  %561 = vmatmul.bf16.vlgmr.msra.gmra.mxu2 %v1661_v32  ;;  %v1160_v57 = vld [vmem:[#allocation5 + $0x158] sm:$0xf0]  ;;  %v1159_v59 = vor.u32 %v1415_v53, %v1158_v52  ;;  %v1014_v60 = vld [vmem:[#allocation5 + $0x28] sm:$0xf]  ;;  %v1379_v61 = vld [vmem:[#allocation5 + $0x34] sm:$0xf0]  ;;  %v1035_v62 = vor.u32 %v1381_v54, %v1032_v55 }
  0x44   :  { %575 = vmatmul.bf16.vlgmr.msra.gmra.mxu3 %v1663_v33  ;;  %547 = vmatmul.bf16.vlgmr.msra.gmra.mxu1 %v1663_v33  ;;  %v1163_v63 = vor.u32 %v1413_v56, %v1160_v57  ;;  %v1142_v0 = vld [vmem:[#allocation5 + $0x128] sm:$0xf]  ;;  %v1411_v1 = vld [vmem:[#allocation5 + $0x134] sm:$0xf0]  ;;  %v1377_v2 = vld [vmem:[#allocation5 + $0x2c] sm:$0xf]  ;;  %v1015_v6 = vor.u32 %v1379_v61, %v1014_v60 }
  0x45   :  { %584 = vmatpush.bf16.msrb.mxu0 %v1063_v34  ;;  %598 = vmatpush.bf16.msrb.mxu1 %v1191_v35  ;;  %v1016_v3 = vld [vmem:[#allocation5 + $0x38] sm:$0xf0]  ;;  %v1409_v4 = vld [vmem:[#allocation5 + $0x12c] sm:$0xf]  ;;  %v1143_v7 = vor.u32 %v1411_v1, %v1142_v0  ;;  %v998_v8 = vld [vmem:[#allocation5 + $0x8] sm:$0xf] }
  0x46   :  { %612 = vmatpush.bf16.msrb.mxu2 %v1067_v38  ;;  %v1144_v5 = vld [vmem:[#allocation5 + $0x138] sm:$0xf0]  ;;  %v1375_v9 = vld [vmem:[#allocation5 + $0x14] sm:$0xf0]  ;;  %v1019_v10 = vor.u32 %v1377_v2, %v1016_v3  ;;  %v1126_v12 = vld [vmem:[#allocation5 + $0x108] sm:$0xf] }
  0x47   :  { %626 = vmatpush.bf16.msrb.mxu3 %v1195_v39  ;;  %v1147_v11 = vor.u32 %v1409_v4, %v1144_v5  ;;  %v1407_v13 = vld [vmem:[#allocation5 + $0x114] sm:$0xf0]  ;;  %v1373_v14 = vld [vmem:[#allocation5 + $0xc] sm:$0xf]  ;;  %v1000_v15 = vld [vmem:[#allocation5 + $0x18] sm:$0xf0]  ;;  %v999_v18 = vor.u32 %v1375_v9, %v998_v8 }
  0x48   :  { %v1405_v16 = vld [vmem:[#allocation5 + $0x10c] sm:$0xf]  ;;  %v1128_v17 = vld [vmem:[#allocation5 + $0x118] sm:$0xf0]  ;;  %v1127_v19 = vor.u32 %v1407_v13, %v1126_v12  ;;  %v1003_v20 = vor.u32 %v1373_v14, %v1000_v15  ;;  %v1442_v24 = vld [vmem:[#allocation8 + $0x30] sm:$0xff] }
  0x49   :  { %585 = vmatpush.bf16.msrb.mxu0 %v1047_v46  ;;  %599 = vmatpush.bf16.msrb.mxu1 %v1175_v47  ;;  %v1131_v21 = vor.u32 %v1405_v16, %v1128_v17  ;;  %v1443_v22 = vld [vmem:[#allocation8 + $0x38] sm:$0xff]  ;;  %v1450_v25 = vld [vmem:[#allocation8 + $0x70] sm:$0xff]  ;;  %v1441_v26 = vld [vmem:[#allocation8 + $0x28] sm:$0xff] }
  0x4a   :  { %613 = vmatpush.bf16.msrb.mxu2 %v1051_v50  ;;  %v1451_v23 = vld [vmem:[#allocation8 + $0x78] sm:$0xff]  ;;  %v1449_v27 = vld [vmem:[#allocation8 + $0x68] sm:$0xff]  ;;  %v1440_v28 = vld [vmem:[#allocation8 + $0x20] sm:$0xff] }
  0x4b   :  { %627 = vmatpush.bf16.msrb.mxu3 %v1179_v51  ;;  %v1439_v29 = vld [vmem:[#allocation8 + $0x18] sm:$0xff]  ;;  %v1448_v30 = vld [vmem:[#allocation8 + $0x60] sm:$0xff]  ;;  %v1438_v31 = vld [vmem:[#allocation8 + $0x10] sm:$0xff] }
  0x4c   :  { %v1447_v34 = vld [vmem:[#allocation8 + $0x58] sm:$0xff]  ;;  %v1437_v35 = vld [vmem:[#allocation8 + $0x8] sm:$0xff]  ;;  %v1458_v38 = vld [vmem:[#allocation8 + $0xb0] sm:$0xff] }
  0x4d   :  { %586 = vmatpush.bf16.msrb.mxu0 %v1031_v58  ;;  %600 = vmatpush.bf16.msrb.mxu1 %v1159_v59  ;;  %v1459_v36 = vld [vmem:[#allocation8 + $0xb8] sm:$0xff]  ;;  %v1445_v37 = vld [vmem:[#allocation8 + $0x48] sm:$0xff]  ;;  %v1444_v39 = vld [vmem:[#allocation8 + $0x40] sm:$0xff] }
  0x4e   :  { %614 = vmatpush.bf16.msrb.mxu2 %v1035_v62  ;;  %v1467_v40 = vld [vmem:[#allocation8 + $0xf8] sm:$0xff]  ;;  %v1457_v41 = vld [vmem:[#allocation8 + $0xa8] sm:$0xff]  ;;  %v1466_v42 = vld [vmem:[#allocation8 + $0xf0] sm:$0xff] }
  0x4f   :  { %628 = vmatpush.bf16.msrb.mxu3 %v1163_v63  ;;  %v1456_v43 = vld [vmem:[#allocation8 + $0xa0] sm:$0xff]  ;;  %v1465_v44 = vld [vmem:[#allocation8 + $0xe8] sm:$0xff]  ;;  %v1455_v45 = vld [vmem:[#allocation8 + $0x98] sm:$0xff] }
  0x50   :  { %v1673_v46 = vld [vmem:[#allocation7] sm:$0xf]  ;;  %v1464_v47 = vld [vmem:[#allocation8 + $0xe0] sm:$0xff]  ;;  %v1454_v51 = vld [vmem:[#allocation8 + $0x90] sm:$0xff] }
  0x51   :  { %587 = vmatpush.bf16.msrb.mxu0 %v1015_v6  ;;  %601 = vmatpush.bf16.msrb.mxu1 %v1143_v7  ;;  %v197_v48 = vperm.slane %v1673_v46, 0  ;;  %v1463_v53 = vld [vmem:[#allocation8 + $0xd8] sm:$0xff]  ;;  %v1453_v54 = vld [vmem:[#allocation8 + $0x88] sm:$0xff]  ;;  %v198_v55 = vperm.slane %v1673_v46, 1  ;;  %v1462_v56 = vld [vmem:[#allocation8 + $0xd0] sm:$0xff]  ;;  %v199_v17 = vperm.slane %v1673_v46, 2 }
  0x52   :  { %615 = vmatpush.bf16.msrb.mxu2 %v1019_v10  ;;  %v1452_v0 = vld [vmem:[#allocation8 + $0x80] sm:$0xff]  ;;  %v1461_v3 = vld [vmem:[#allocation8 + $0xc8] sm:$0xff] }
  0x53   :  { %629 = vmatpush.bf16.msrb.mxu3 %v1147_v11  ;;  %v1460_v6 = vld [vmem:[#allocation8 + $0xc0] sm:$0xff] }
  0x55   :  { %588 = vmatpush.bf16.msrb.mxu0 %v999_v18  ;;  %602 = vmatpush.bf16.msrb.mxu1 %v1127_v19 }
  0x56   :  { %616 = vmatpush.bf16.msrb.mxu2 %v1003_v20 }
  0x57   :  { %630 = vmatpush.bf16.msrb.mxu3 %v1131_v21  ;;  %v200_v21 = vperm.slane %v1673_v46, 3 }
  0x58   :  { %589 = vmatmul.bf16.vlgmr.msrb.gmra.mxu0 %v1661_v32  ;;  %603 = vmatmul.bf16.vlgmr.msrb.gmra.mxu1 %v1663_v33 }
  0x59   :  { %909 = vmatpush.bf16.msra.mxu0 %v1443_v22  ;;  %923 = vmatpush.bf16.msra.mxu1 %v1451_v23 }
  0x5a   :  { %617 = vmatmul.bf16.vlgmr.msrb.gmra.mxu2 %v1661_v32  ;;  %631 = vmatmul.bf16.vlgmr.msrb.gmra.mxu3 %v1663_v33  ;;  %v1446_v32 = vld [vmem:[#allocation8 + $0x50] sm:$0xff]  ;;  %v1436_v33 = vld [vmem:[#allocation8] sm:$0xff] }
  0x5b   :  { %937 = vmatpush.bf16.msra.mxu2 %v1459_v36  ;;  %951 = vmatpush.bf16.msra.mxu3 %v1467_v40 }
  0x5d   :  { %910 = vmatpush.bf16.msra.mxu0 %v1442_v24  ;;  %924 = vmatpush.bf16.msra.mxu1 %v1450_v25 }
  0x5f   :  { %938 = vmatpush.bf16.msra.mxu2 %v1458_v38  ;;  %952 = vmatpush.bf16.msra.mxu3 %v1466_v42 }
  0x61   :  { %911 = vmatpush.bf16.msra.mxu0 %v1441_v26  ;;  %925 = vmatpush.bf16.msra.mxu1 %v1449_v27 }
  0x63   :  { %939 = vmatpush.bf16.msra.mxu2 %v1457_v41  ;;  %953 = vmatpush.bf16.msra.mxu3 %v1465_v44 }
  0x65   :  { %912 = vmatpush.bf16.msra.mxu0 %v1440_v28  ;;  %926 = vmatpush.bf16.msra.mxu1 %v1448_v30 }
  0x67   :  { %940 = vmatpush.bf16.msra.mxu2 %v1456_v43  ;;  %954 = vmatpush.bf16.msra.mxu3 %v1464_v47 }
  0x69   :  { %913 = vmatpush.bf16.msra.mxu0 %v1439_v29  ;;  %927 = vmatpush.bf16.msra.mxu1 %v1447_v34 }
  0x6b   :  { %941 = vmatpush.bf16.msra.mxu2 %v1455_v45  ;;  %955 = vmatpush.bf16.msra.mxu3 %v1463_v53 }
  0x6d   :  { %914 = vmatpush.bf16.msra.mxu0 %v1438_v31  ;;  %928 = vmatpush.bf16.msra.mxu1 %v1446_v32 }
  0x6f   :  { %942 = vmatpush.bf16.msra.mxu2 %v1454_v51  ;;  %956 = vmatpush.bf16.msra.mxu3 %v1462_v56 }
  0x71   :  { %915 = vmatpush.bf16.msra.mxu0 %v1437_v35  ;;  %929 = vmatpush.bf16.msra.mxu1 %v1445_v37 }
  0x73   :  { %943 = vmatpush.bf16.msra.mxu2 %v1453_v54  ;;  %957 = vmatpush.bf16.msra.mxu3 %v1461_v3 }
  0x75   :  { %916 = vmatpush.bf16.msra.mxu0 %v1436_v33  ;;  %930 = vmatpush.bf16.msra.mxu1 %v1444_v39  ;;  %v1479_v39 = vld [vmem:[%s1689_s4] ss:$0 sm:$0xff] }
  0x77   :  { %944 = vmatpush.bf16.msra.mxu2 %v1452_v0  ;;  %958 = vmatpush.bf16.msra.mxu3 %v1460_v6 }
  0xbf   :  { %v534_v49 = vpop.f32.mrf.mxu0 }
  0xc0   :  { %v535_v52 = vadd.f32 %v534_v49, %v197_v48 }
  0xc1   :  { %v548_v50 = vpop.f32.mrf.mxu1 }
  0xc2   :  { %v549_v58 = vadd.f32 %v548_v50, %v535_v52 }
  0xc4   :  { %v637_v1 = vmax.f32 %v549_v58, 0.0 }
  0xc6   :  { %v562_v57 = vpop.f32.mrf.mxu2 }
  0xc7   :  { %v576_v59 = vpop.f32.mrf.mxu3  ;;  %v536_v60 = vpop.f32.mrf.mxu0  ;;  %v563_v61 = vadd.f32 %v562_v57, %v198_v55 }
  0xc8   :  { %v537_v62 = vadd.f32 %v536_v60, %v197_v48 }
  0xc9   :  { %v550_v63 = vpop.f32.mrf.mxu1  ;;  %v577_v4 = vadd.f32 %v576_v59, %v563_v61 }
  0xca   :  { %v551_v2 = vadd.f32 %v550_v63, %v537_v62 }
  0xcb   :  { %v638_v11 = vmax.f32 %v577_v4, 0.0 }
  0xcc   :  { %v641_v5 = vmax.f32 %v551_v2, 0.0 }
  0xce   :  { %v564_v7 = vpop.f32.mrf.mxu2  ;;  %v645_v8 = vpack.c.bf16 %v641_v5, %v637_v1 }
  0xcf   :  { %v565_v9 = vadd.f32 %v564_v7, %v198_v55  ;;  %v578_v10 = vpop.f32.mrf.mxu3 }
  0xd0   :  { %917 = vmatmul.bf16.vlgmr.msra.gmra.mxu0 %v645_v8 }
  0xd1   :  { %v579_v12 = vadd.f32 %v578_v10, %v565_v9 }
  0xd3   :  { %v642_v13 = vmax.f32 %v579_v12, 0.0 }
  0xd5   :  { %v646_v14 = vpack.c.bf16 %v642_v13, %v638_v11  ;;  %v590_v15 = vpop.f32.mrf.mxu0  ;;  %v604_v16 = vpop.f32.mrf.mxu1 }
  0xd6   :  { %v591_v18 = vadd.f32 %v590_v15, %v199_v17 }
  0xd7   :  { %931 = vmatmul.bf16.vlgmr.msra.gmra.mxu1 %v646_v14 }
  0xd8   :  { %v605_v23 = vadd.f32 %v604_v16, %v591_v18 }
  0xda   :  { %v639_v28 = vmax.f32 %v605_v23, 0.0 }
  0xdd   :  { %v618_v19 = vpop.f32.mrf.mxu2  ;;  %v632_v20 = vpop.f32.mrf.mxu3 }
  0xde   :  { %v592_v22 = vpop.f32.mrf.mxu0  ;;  %v606_v25 = vpop.f32.mrf.mxu1  ;;  %v619_v27 = vadd.f32 %v618_v19, %v200_v21 }
  0xdf   :  { %v593_v24 = vadd.f32 %v592_v22, %v199_v17 }
  0xe0   :  { %v633_v34 = vadd.f32 %v632_v20, %v619_v27 }
  0xe1   :  { %v607_v26 = vadd.f32 %v606_v25, %v593_v24 }
  0xe2   :  { %v640_v36 = vmax.f32 %v633_v34, 0.0 }
  0xe3   :  { %v643_v29 = vmax.f32 %v607_v26, 0.0 }
  0xe5   :  { %v647_v30 = vpack.c.bf16 %v643_v29, %v639_v28  ;;  %v620_v31 = vpop.f32.mrf.mxu2  ;;  %v634_v32 = vpop.f32.mrf.mxu3 }
  0xe6   :  { %v621_v35 = vadd.f32 %v620_v31, %v200_v21 }
  0xe7   :  { %945 = vmatmul.bf16.vlgmr.msra.gmra.mxu2 %v647_v30 }
  0xe8   :  { %v635_v33 = vadd.f32 %v634_v32, %v621_v35 }
  0xea   :  { %v644_v37 = vmax.f32 %v635_v33, 0.0 }
  0xec   :  { %v648_v38 = vpack.c.bf16 %v644_v37, %v640_v36 }
  0xee   :  { %959 = vmatmul.bf16.vlgmr.msra.gmra.mxu3 %v648_v38 }
 0x14d   :  { %v918_v40 = vpop.f32.mrf.mxu0 }
 0x14e   :  { %v919_v42 = vadd.f32 %v1479_v39, %v918_v40 }
 0x154   :  { %v932_v41 = vpop.f32.mrf.mxu1 }
 0x155   :  { %v933_v44 = vadd.f32 %v932_v41, %v919_v42  ;;  %v920_v46 = vpop.f32.mrf.mxu0 }
 0x156   :  { %v921_v50 = vadd.f32 %v1479_v39, %v920_v46 }
 0x15c   :  { %v934_v49 = vpop.f32.mrf.mxu1 }
 0x15d   :  { %v935_v52 = vadd.f32 %v934_v49, %v921_v50 }
 0x16a   :  { %v946_v43 = vpop.f32.mrf.mxu2 }
 0x16b   :  { %v947_v45 = vadd.f32 %v946_v43, %v933_v44 }
 0x171   :  { %v960_v47 = vpop.f32.mrf.mxu3 }
 0x172   :  { %v961_v48 = vadd.f32 %v960_v47, %v947_v45  ;;  %v948_v51 = vpop.f32.mrf.mxu2 }
 0x173   :  { %v949_v53 = vadd.f32 %v948_v51, %v935_v52 }
 0x174   :  { %965 = vst [vmem:[#allocation10] sm:$0xff] %v961_v48 }
 0x179   :  { %v962_v54 = vpop.f32.mrf.mxu3 }
 0x17a   :  { %v963_v55 = vadd.f32 %v962_v54, %v949_v53 }
 0x17c   :  { %966 = vst [vmem:[#allocation10 + $0x8] sm:$0xff] %v963_v55 }
 0x17d   :  { %970 = vsyncadd [#allocation4], 224  ;;  %s973_s16 = sshll.u32 %s1690_s5, 4  ;;  %s1616_s17 = smov [#allocation10]   ;;  %s974_s16 = int_to_ptr.hbm [resolvable:$true] %s973_s16 }
 0x17e   :  { %s971_s18 = sshll.u32 %s1616_s17, 4  ;;  %s1617_s19 = smov 32   ;;  %s972_s18 = int_to_ptr.vmem [resolvable:$true] %s971_s18 }
 0x17f   :  { %s1618_s20 = smov 2  }
 0x180   :  { %979 = dma.vmem_to_hbm [thread:$0]  %s972_s18, 32, %s974_s16, [#allocation4], %s1617_s19, %s1617_s19, %s1618_s20  }
 0x181   :  { %1606 = dma.done.wait [#allocation4], 256  }
 0x182   :  { %1607 = vsyncadd [#allocation4], 4294967040 }
 0x183   :  { %984 = vsyncpa [#allocation3], 1 }
 0x184   :  { %985 = vsyncpa [#allocation6], 1 }
 0x185   :  { %986 = vsyncpa [#allocation9], 1 }
 0x186   :  { %987 = vsyncpa [#allocation4], 1 }

// kernel: tpu_custom_call.1
= control target key start
LH: loop header
LB: loop body
LE: loop exit
PB: predicated region body
PF: predicated region fallthrough
CT: control target
= control target key end

     0   :  { %10 = vsyncpa [#allocation3], 0  ;;  %s1685_s0 = inlined_call_operand.hbm [shape: f32[2,256], index: 0, kind: input, shape index: {}]   ;;  %s1686_s1 = inlined_call_operand.hbm [shape: bf16[256,512], index: 1, kind: input, shape index: {}]   ;;  %s1687_s2 = inlined_call_operand.hbm [shape: f32[1,512], index: 2, kind: input, shape index: {}]   ;;  %s1688_s3 = inlined_call_operand.hbm [shape: bf16[512,128], index: 3, kind: input, shape index: {}]   ;;  %s1689_s4 = inlined_call_operand.vmem [shape: f32[1,128], index: 4, kind: input, shape index: {}]   ;;  %s1690_s5 = inlined_call_operand.hbm [shape: f32[2,128], index: 5, kind: output, shape index: {}]  }
   0x1   :  { %11 = vsyncpa [#allocation6], 0 }
   0x2   :  { %12 = vsyncpa [#allocation9], 0 }
   0x3   :  { %13 = vsyncpa [#allocation4], 0  ;;  %s31_s20 = sshll.u32 %s1686_s1, 4  ;;  %s32_s20 = int_to_ptr.hbm [resolvable:$true] %s31_s20 }
   0x4   :  { %17 = vsyncadd [#allocation3], 448  ;;  %s1608_s21 = smov [#allocation5]   ;;  %s18_s25 = sshll.u32 %s1685_s0, 4  ;;  %s19_s25 = int_to_ptr.hbm [resolvable:$true] %s18_s25 }
   0x5   :  { %s33_s22 = sshll.u32 %s1608_s21, 4  ;;  %s1609_s26 = smov 256   ;;  %s34_s22 = int_to_ptr.vmem [resolvable:$true] %s33_s22 }
   0x6   :  { %s1610_s27 = smov 16   ;;  %s1611_s28 = smov [#allocation2]  }
   0x7   :  { %39 = dma.hbm_to_vmem [thread:$0]  %s32_s20, 8192, %s34_s22, [#allocation6], %s1609_s26, %s1609_s26, %s1610_s27  }
   0x8   :  { %s20_s29 = sshll.u32 %s1611_s28, 4  ;;  %s1612_s30 = smov 64   ;;  %s21_s29 = int_to_ptr.vmem [resolvable:$true] %s20_s29 }
   0x9   :  { %s1613_s6 = smov 4   ;;  %s45_s8 = sshll.u32 %s1687_s2, 4  ;;  %s46_s8 = int_to_ptr.hbm [resolvable:$true] %s45_s8 }
   0xa   :  { %26 = dma.hbm_to_vmem [thread:$0]  %s19_s25, 64, %s21_s29, [#allocation3], %s1612_s30, %s1612_s30, %s1613_s6  }
   0xb   :  { %s1614_s9 = smov [#allocation7]   ;;  %s55_s12 = sshll.u32 %s1688_s3, 4  ;;  %s56_s12 = int_to_ptr.hbm [resolvable:$true] %s55_s12 }
   0xc   :  { %s47_s10 = sshll.u32 %s1614_s9, 4  ;;  %s1615_s13 = smov [#allocation8]   ;;  %s48_s10 = int_to_ptr.vmem [resolvable:$true] %s47_s10 }
   0xd   :  { %50 = dma.hbm_to_vmem [thread:$0]  %s46_s8, 64, %s48_s10, [#allocation6]  }
   0xe   :  { %s57_s14 = sshll.u32 %s1615_s13, 4  ;;  %s58_s14 = int_to_ptr.vmem [resolvable:$true] %s57_s14 }
   0xf   :  { %63 = dma.hbm_to_vmem [thread:$0]  %s56_s12, 4096, %s58_s14, [#allocation9], %s1612_s30, %s1612_s30, %s1613_s6  }
  0x10   :  { %1600 = dma.done.wait [#allocation3], 512  }
  0x11   :  { %1601 = vsyncadd [#allocation3], 4294966784 }
  0x12   :  { %1602 = dma.done.wait [#allocation6], 8256  }
  0x13   :  { %1603 = vsyncadd [#allocation6], 4294959040 }
  0x14   :  { %1604 = dma.done.wait [#allocation9], 4096  }
  0x15   :  { %1605 = vsyncadd [#allocation9], 4294963200  ;;  %v1102_v0 = vld [vmem:[#allocation5 + $0xe0] sm:$0xf]  ;;  %v1402_v1 = vld [vmem:[#allocation5 + $0xec] sm:$0xf0] }
  0x16   :  { %v1230_v2 = vld [vmem:[#allocation5 + $0x1e0] sm:$0xf]  ;;  %v1103_v3 = vor.u32 %v1402_v1, %v1102_v0  ;;  %v1434_v4 = vld [vmem:[#allocation5 + $0x1ec] sm:$0xf0]  ;;  %v1400_v5 = vld [vmem:[#allocation5 + $0xe4] sm:$0xf] }
  0x17   :  { %v1104_v6 = vld [vmem:[#allocation5 + $0xf0] sm:$0xf0]  ;;  %v1231_v7 = vor.u32 %v1434_v4, %v1230_v2  ;;  %v1432_v9 = vld [vmem:[#allocation5 + $0x1e4] sm:$0xf]  ;;  %v1086_v11 = vld [vmem:[#allocation5 + $0xc0] sm:$0xf] }
  0x18   :  { %v1107_v8 = vor.u32 %v1400_v5, %v1104_v6  ;;  %v1232_v10 = vld [vmem:[#allocation5 + $0x1f0] sm:$0xf0]  ;;  %525 = vmatpush.bf16.msra.mxu0 %v1103_v3  ;;  %v1398_v13 = vld [vmem:[#allocation5 + $0xcc] sm:$0xf0]  ;;  %v1214_v14 = vld [vmem:[#allocation5 + $0x1c0] sm:$0xf] }
  0x19   :  { %v1235_v12 = vor.u32 %v1432_v9, %v1232_v10  ;;  %v1430_v15 = vld [vmem:[#allocation5 + $0x1cc] sm:$0xf0]  ;;  %539 = vmatpush.bf16.msra.mxu1 %v1231_v7  ;;  %v1087_v16 = vor.u32 %v1398_v13, %v1086_v11  ;;  %v1396_v18 = vld [vmem:[#allocation5 + $0xc4] sm:$0xf]  ;;  %v1088_v19 = vld [vmem:[#allocation5 + $0xd0] sm:$0xf0] }
  0x1a   :  { %553 = vmatpush.bf16.msra.mxu2 %v1107_v8  ;;  %v1215_v17 = vor.u32 %v1430_v15, %v1214_v14  ;;  %v1428_v20 = vld [vmem:[#allocation5 + $0x1c4] sm:$0xf]  ;;  %v1091_v21 = vor.u32 %v1396_v18, %v1088_v19  ;;  %v1216_v22 = vld [vmem:[#allocation5 + $0x1d0] sm:$0xf0]  ;;  %v1070_v23 = vld [vmem:[#allocation5 + $0xa0] sm:$0xf] }
  0x1b   :  { %567 = vmatpush.bf16.msra.mxu3 %v1235_v12  ;;  %v1394_v24 = vld [vmem:[#allocation5 + $0xac] sm:$0xf0]  ;;  %v1219_v25 = vor.u32 %v1428_v20, %v1216_v22  ;;  %v1198_v26 = vld [vmem:[#allocation5 + $0x1a0] sm:$0xf]  ;;  %v1392_v28 = vld [vmem:[#allocation5 + $0xa4] sm:$0xf] }
  0x1c   :  { %v1426_v27 = vld [vmem:[#allocation5 + $0x1ac] sm:$0xf0]  ;;  %526 = vmatpush.bf16.msra.mxu0 %v1087_v16  ;;  %v1071_v29 = vor.u32 %v1394_v24, %v1070_v23  ;;  %v1072_v30 = vld [vmem:[#allocation5 + $0xb0] sm:$0xf0]  ;;  %v1424_v31 = vld [vmem:[#allocation5 + $0x1a4] sm:$0xf] }
  0x1d   :  { %v1200_v32 = vld [vmem:[#allocation5 + $0x1b0] sm:$0xf0]  ;;  %540 = vmatpush.bf16.msra.mxu1 %v1215_v17  ;;  %v1199_v33 = vor.u32 %v1426_v27, %v1198_v26  ;;  %v1075_v34 = vor.u32 %v1392_v28, %v1072_v30  ;;  %v1054_v35 = vld [vmem:[#allocation5 + $0x80] sm:$0xf]  ;;  %v1390_v36 = vld [vmem:[#allocation5 + $0x8c] sm:$0xf0] }
  0x1e   :  { %554 = vmatpush.bf16.msra.mxu2 %v1091_v21  ;;  %v1182_v37 = vld [vmem:[#allocation5 + $0x180] sm:$0xf]  ;;  %v1203_v38 = vor.u32 %v1424_v31, %v1200_v32  ;;  %v1422_v39 = vld [vmem:[#allocation5 + $0x18c] sm:$0xf0]  ;;  %v1388_v40 = vld [vmem:[#allocation5 + $0x84] sm:$0xf]  ;;  %v1055_v44 = vor.u32 %v1390_v36, %v1054_v35 }
  0x1f   :  { %568 = vmatpush.bf16.msra.mxu3 %v1219_v25  ;;  %v1056_v41 = vld [vmem:[#allocation5 + $0x90] sm:$0xf0]  ;;  %v1420_v42 = vld [vmem:[#allocation5 + $0x184] sm:$0xf]  ;;  %v1183_v45 = vor.u32 %v1422_v39, %v1182_v37  ;;  %v1038_v47 = vld [vmem:[#allocation5 + $0x60] sm:$0xf] }
  0x20   :  { %v1184_v43 = vld [vmem:[#allocation5 + $0x190] sm:$0xf0]  ;;  %527 = vmatpush.bf16.msra.mxu0 %v1071_v29  ;;  %v1059_v46 = vor.u32 %v1388_v40, %v1056_v41  ;;  %v1386_v48 = vld [vmem:[#allocation5 + $0x6c] sm:$0xf0]  ;;  %v1166_v49 = vld [vmem:[#allocation5 + $0x160] sm:$0xf] }
  0x21   :  { %541 = vmatpush.bf16.msra.mxu1 %v1199_v33  ;;  %v1187_v50 = vor.u32 %v1420_v42, %v1184_v43  ;;  %v1418_v51 = vld [vmem:[#allocation5 + $0x16c] sm:$0xf0]  ;;  %v1384_v52 = vld [vmem:[#allocation5 + $0x64] sm:$0xf]  ;;  %v1040_v53 = vld [vmem:[#allocation5 + $0x70] sm:$0xf0]  ;;  %v1039_v56 = vor.u32 %v1386_v48, %v1038_v47 }
  0x22   :  { %555 = vmatpush.bf16.msra.mxu2 %v1075_v34  ;;  %v1416_v54 = vld [vmem:[#allocation5 + $0x164] sm:$0xf]  ;;  %v1168_v55 = vld [vmem:[#allocation5 + $0x170] sm:$0xf0]  ;;  %v1167_v57 = vor.u32 %v1418_v51, %v1166_v49  ;;  %v1043_v58 = vor.u32 %v1384_v52, %v1040_v53  ;;  %v1022_v59 = vld [vmem:[#allocation5 + $0x40] sm:$0xf] }
  0x23   :  { %569 = vmatpush.bf16.msra.mxu3 %v1203_v38  ;;  %v1382_v60 = vld [vmem:[#allocation5 + $0x4c] sm:$0xf0]  ;;  %v1150_v61 = vld [vmem:[#allocation5 + $0x140] sm:$0xf]  ;;  %v1171_v62 = vor.u32 %v1416_v54, %v1168_v55  ;;  %v1380_v0 = vld [vmem:[#allocation5 + $0x44] sm:$0xf] }
  0x24   :  { %528 = vmatpush.bf16.msra.mxu0 %v1055_v44  ;;  %v1414_v63 = vld [vmem:[#allocation5 + $0x14c] sm:$0xf0]  ;;  %v1024_v1 = vld [vmem:[#allocation5 + $0x50] sm:$0xf0]  ;;  %v1412_v2 = vld [vmem:[#allocation5 + $0x144] sm:$0xf]  ;;  %v1023_v4 = vor.u32 %v1382_v60, %v1022_v59 }
  0x25   :  { %542 = vmatpush.bf16.msra.mxu1 %v1183_v45  ;;  %v1152_v3 = vld [vmem:[#allocation5 + $0x150] sm:$0xf0]  ;;  %v1006_v5 = vld [vmem:[#allocation5 + $0x20] sm:$0xf]  ;;  %v1151_v6 = vor.u32 %v1414_v63, %v1150_v61  ;;  %v1027_v7 = vor.u32 %v1380_v0, %v1024_v1  ;;  %v1378_v8 = vld [vmem:[#allocation5 + $0x2c] sm:$0xf0] }
  0x26   :  { %556 = vmatpush.bf16.msra.mxu2 %v1059_v46  ;;  %v1134_v9 = vld [vmem:[#allocation5 + $0x120] sm:$0xf]  ;;  %v1410_v10 = vld [vmem:[#allocation5 + $0x12c] sm:$0xf0]  ;;  %v1155_v11 = vor.u32 %v1412_v2, %v1152_v3  ;;  %v1376_v12 = vld [vmem:[#allocation5 + $0x24] sm:$0xf]  ;;  %v1007_v18 = vor.u32 %v1378_v8, %v1006_v5 }
  0x27   :  { %570 = vmatpush.bf16.msra.mxu3 %v1187_v50  ;;  %v1008_v13 = vld [vmem:[#allocation5 + $0x30] sm:$0xf0]  ;;  %v1408_v14 = vld [vmem:[#allocation5 + $0x124] sm:$0xf]  ;;  %v990_v16 = vld [vmem:[#allocation5] sm:$0xf]  ;;  %v1135_v23 = vor.u32 %v1410_v10, %v1134_v9 }
  0x28   :  { %529 = vmatpush.bf16.msra.mxu0 %v1039_v56  ;;  %v1136_v15 = vld [vmem:[#allocation5 + $0x130] sm:$0xf0]  ;;  %v1374_v17 = vld [vmem:[#allocation5 + $0xc] sm:$0xf0]  ;;  %v1118_v19 = vld [vmem:[#allocation5 + $0x100] sm:$0xf]  ;;  %v1011_v24 = vor.u32 %v1376_v12, %v1008_v13 }
  0x29   :  { %543 = vmatpush.bf16.msra.mxu1 %v1167_v57  ;;  %v1406_v20 = vld [vmem:[#allocation5 + $0x10c] sm:$0xf0]  ;;  %v1372_v21 = vld [vmem:[#allocation5 + $0x4] sm:$0xf]  ;;  %v992_v22 = vld [vmem:[#allocation5 + $0x10] sm:$0xf0]  ;;  %v1139_v32 = vor.u32 %v1408_v14, %v1136_v15  ;;  %v991_v44 = vor.u32 %v1374_v17, %v990_v16 }
  0x2a   :  { %557 = vmatpush.bf16.msra.mxu2 %v1043_v58  ;;  %v1404_v25 = vld [vmem:[#allocation5 + $0x104] sm:$0xf]  ;;  %v1120_v26 = vld [vmem:[#allocation5 + $0x110] sm:$0xf0]  ;;  %v1110_v27 = vld [vmem:[#allocation5 + $0xe8] sm:$0xf]  ;;  %v1119_v49 = vor.u32 %v1406_v20, %v1118_v19  ;;  %v995_v50 = vor.u32 %v1372_v21, %v992_v22 }
  0x2b   :  { %571 = vmatpush.bf16.msra.mxu3 %v1171_v62  ;;  %v1403_v28 = vld [vmem:[#allocation5 + $0xf4] sm:$0xf0]  ;;  %v82_v29 = vld [vmem:[#allocation2] sm:$0xf]  ;;  %v83_v30 = vld [vmem:[#allocation2 + $0x4] sm:$0xf]  ;;  %v1123_v54 = vor.u32 %v1404_v25, %v1120_v26 }
  0x2c   :  { %530 = vmatpush.bf16.msra.mxu0 %v1023_v4  ;;  %v84_v31 = vld [vmem:[#allocation2 + $0x8] sm:$0xf]  ;;  %v1435_v34 = vld [vmem:[#allocation5 + $0x1f4] sm:$0xf0]  ;;  %v1401_v35 = vld [vmem:[#allocation5 + $0xec] sm:$0xf]  ;;  %v1111_v55 = vor.u32 %v1403_v28, %v1110_v27 }
  0x2d   :  { %544 = vmatpush.bf16.msra.mxu1 %v1151_v6  ;;  %v1238_v33 = vld [vmem:[#allocation5 + $0x1e8] sm:$0xf]  ;;  %v1112_v36 = vld [vmem:[#allocation5 + $0xf8] sm:$0xf0]  ;;  %v85_v37 = vld [vmem:[#allocation2 + $0xc] sm:$0xf] }
  0x2e   :  { %558 = vmatpush.bf16.msra.mxu2 %v1027_v7  ;;  %v86_v38 = vld [vmem:[#allocation2 + $0x10] sm:$0xf]  ;;  %v87_v39 = vld [vmem:[#allocation2 + $0x14] sm:$0xf]  ;;  %v88_v40 = vld [vmem:[#allocation2 + $0x18] sm:$0xf]  ;;  %v1239_v59 = vor.u32 %v1435_v34, %v1238_v33  ;;  %v1115_v60 = vor.u32 %v1401_v35, %v1112_v36 }
  0x2f   :  { %572 = vmatpush.bf16.msra.mxu3 %v1155_v11  ;;  %v89_v41 = vld [vmem:[#allocation2 + $0x1c] sm:$0xf]  ;;  %v90_v42 = vmax.f32 %v82_v29, 0.0  ;;  %v91_v43 = vmax.f32 %v83_v30, 0.0  ;;  %v1433_v45 = vld [vmem:[#allocation5 + $0x1ec] sm:$0xf] }
  0x30   :  { %531 = vmatpush.bf16.msra.mxu0 %v1007_v18  ;;  %v1240_v46 = vld [vmem:[#allocation5 + $0x1f8] sm:$0xf0]  ;;  %v92_v47 = vmax.f32 %v84_v31, 0.0  ;;  %v93_v48 = vmax.f32 %v85_v37, 0.0  ;;  %v94_v51 = vmax.f32 %v86_v38, 0.0  ;;  %v95_v52 = vmax.f32 %v87_v39, 0.0 }
  0x31   :  { %545 = vmatpush.bf16.msra.mxu1 %v1135_v23  ;;  %106 = vst [vmem:[#allocation1] ss:$4 sm:$0xff] %v90_v42  ;;  %v1094_v53 = vld [vmem:[#allocation5 + $0xc8] sm:$0xf]  ;;  %v96_v56 = vmax.f32 %v88_v40, 0.0  ;;  %v97_v57 = vmax.f32 %v89_v41, 0.0  ;;  %v1243_v63 = vor.u32 %v1433_v45, %v1240_v46 }
  0x32   :  { %559 = vmatpush.bf16.msra.mxu2 %v1011_v24  ;;  %108 = vst [vmem:[#allocation1 + $0x1] ss:$4 sm:$0xff] %v91_v43  ;;  %v1399_v58 = vld [vmem:[#allocation5 + $0xd4] sm:$0xf0]  ;;  %v1222_v61 = vld [vmem:[#allocation5 + $0x1c8] sm:$0xf] }
  0x33   :  { %573 = vmatpush.bf16.msra.mxu3 %v1139_v32  ;;  %110 = vst [vmem:[#allocation1 + $0x2] ss:$4 sm:$0xff] %v92_v47  ;;  %v1431_v62 = vld [vmem:[#allocation5 + $0x1d4] sm:$0xf0]  ;;  %v1397_v0 = vld [vmem:[#allocation5 + $0xcc] sm:$0xf]  ;;  %v1095_v4 = vor.u32 %v1399_v58, %v1094_v53 }
  0x34   :  { %532 = vmatpush.bf16.msra.mxu0 %v991_v44  ;;  %112 = vst [vmem:[#allocation1 + $0x3] ss:$4 sm:$0xff] %v93_v48  ;;  %v1096_v1 = vld [vmem:[#allocation5 + $0xd8] sm:$0xf0]  ;;  %v1429_v2 = vld [vmem:[#allocation5 + $0x1cc] sm:$0xf]  ;;  %v1223_v7 = vor.u32 %v1431_v62, %v1222_v61 }
  0x35   :  { %546 = vmatpush.bf16.msra.mxu1 %v1119_v49  ;;  %114 = vst [vmem:[#allocation1 + $0x20] ss:$4 sm:$0xff] %v94_v51  ;;  %v1224_v3 = vld [vmem:[#allocation5 + $0x1d8] sm:$0xf0]  ;;  %v1078_v5 = vld [vmem:[#allocation5 + $0xa8] sm:$0xf]  ;;  %v1099_v8 = vor.u32 %v1397_v0, %v1096_v1 }
  0x36   :  { %560 = vmatpush.bf16.msra.mxu2 %v995_v50  ;;  %116 = vst [vmem:[#allocation1 + $0x21] ss:$4 sm:$0xff] %v95_v52  ;;  %v1395_v6 = vld [vmem:[#allocation5 + $0xb4] sm:$0xf0]  ;;  %v1206_v9 = vld [vmem:[#allocation5 + $0x1a8] sm:$0xf]  ;;  %v1227_v11 = vor.u32 %v1429_v2, %v1224_v3 }
  0x37   :  { %574 = vmatpush.bf16.msra.mxu3 %v1123_v54  ;;  %118 = vst [vmem:[#allocation1 + $0x22] ss:$4 sm:$0xff] %v96_v56  ;;  %v1427_v10 = vld [vmem:[#allocation5 + $0x1b4] sm:$0xf0]  ;;  %v1393_v12 = vld [vmem:[#allocation5 + $0xac] sm:$0xf]  ;;  %v1079_v16 = vor.u32 %v1395_v6, %v1078_v5 }
  0x38   :  { %581 = vmatpush.bf16.msrb.mxu0 %v1111_v55  ;;  %120 = vst [vmem:[#allocation1 + $0x23] ss:$4 sm:$0xff] %v97_v57  ;;  %v1080_v13 = vld [vmem:[#allocation5 + $0xb8] sm:$0xf0]  ;;  %v1425_v14 = vld [vmem:[#allocation5 + $0x1ac] sm:$0xf]  ;;  %v1207_v17 = vor.u32 %v1427_v10, %v1206_v9 }
  0x39   :  { %595 = vmatpush.bf16.msrb.mxu1 %v1239_v59  ;;  %v1208_v15 = vld [vmem:[#allocation5 + $0x1b8] sm:$0xf0]  ;;  %v1083_v18 = vor.u32 %v1393_v12, %v1080_v13  ;;  %v1062_v19 = vld [vmem:[#allocation5 + $0x88] sm:$0xf]  ;;  %v1391_v20 = vld [vmem:[#allocation5 + $0x94] sm:$0xf0] }
  0x3a   :  { %609 = vmatpush.bf16.msrb.mxu2 %v1115_v60  ;;  %v1211_v21 = vor.u32 %v1425_v14, %v1208_v15  ;;  %v1190_v22 = vld [vmem:[#allocation5 + $0x188] sm:$0xf]  ;;  %v1423_v23 = vld [vmem:[#allocation5 + $0x194] sm:$0xf0]  ;;  %v1389_v24 = vld [vmem:[#allocation5 + $0x8c] sm:$0xf]  ;;  %v1063_v34 = vor.u32 %v1391_v20, %v1062_v19 }
  0x3b   :  { %623 = vmatpush.bf16.msrb.mxu3 %v1243_v63  ;;  %v121_v25 = vld.sshfl [vmem:[#allocation1] sm:$0xff pattern:$0x73625140]  ;;  %v122_v26 = vld.sshfl [vmem:[#allocation1 + $0x8] sm:$0xff pattern:$0x73625140]  ;;  %v1191_v35 = vor.u32 %v1423_v23, %v1190_v22 }
  0x3c   :  { %582 = vmatpush.bf16.msrb.mxu0 %v1095_v4  ;;  %v1064_v27 = vld [vmem:[#allocation5 + $0x98] sm:$0xf0]  ;;  %v1421_v28 = vld [vmem:[#allocation5 + $0x18c] sm:$0xf]  ;;  %v1046_v36 = vld [vmem:[#allocation5 + $0x68] sm:$0xf] }
  0x3d   :  { %596 = vmatpush.bf16.msrb.mxu1 %v1223_v7  ;;  %v1192_v29 = vld [vmem:[#allocation5 + $0x198] sm:$0xf0]  ;;  %v1387_v37 = vld [vmem:[#allocation5 + $0x74] sm:$0xf0]  ;;  %v1067_v38 = vor.u32 %v1389_v24, %v1064_v27  ;;  %v1174_v40 = vld [vmem:[#allocation5 + $0x168] sm:$0xf] }
  0x3e   :  { %610 = vmatpush.bf16.msrb.mxu2 %v1099_v8  ;;  %v1195_v39 = vor.u32 %v1421_v28, %v1192_v29  ;;  %v1419_v41 = vld [vmem:[#allocation5 + $0x174] sm:$0xf0]  ;;  %v1385_v42 = vld [vmem:[#allocation5 + $0x6c] sm:$0xf]  ;;  %v1048_v43 = vld [vmem:[#allocation5 + $0x78] sm:$0xf0]  ;;  %v1047_v46 = vor.u32 %v1387_v37, %v1046_v36 }
  0x3f   :  { %624 = vmatpush.bf16.msrb.mxu3 %v1227_v11  ;;  %v123_v30 = vld.sshfl [vmem:[#allocation1 + $0x20] sm:$0xff pattern:$0x73625140]  ;;  %v124_v31 = vld.sshfl [vmem:[#allocation1 + $0x28] sm:$0xff pattern:$0x73625140]  ;;  %v1175_v47 = vor.u32 %v1419_v41, %v1174_v40  ;;  %v1051_v50 = vor.u32 %v1385_v42, %v1048_v43 }
  0x40   :  { %583 = vmatpush.bf16.msrb.mxu0 %v1079_v16  ;;  %v1661_v32 = vpack.c.bf16 %v123_v30, %v121_v25  ;;  %v1663_v33 = vpack.c.bf16 %v124_v31, %v122_v26  ;;  %v1417_v44 = vld [vmem:[#allocation5 + $0x16c] sm:$0xf]  ;;  %v1176_v45 = vld [vmem:[#allocation5 + $0x178] sm:$0xf0]  ;;  %v1030_v48 = vld [vmem:[#allocation5 + $0x48] sm:$0xf] }
  0x41   :  { %597 = vmatpush.bf16.msrb.mxu1 %v1207_v17  ;;  %v1383_v49 = vld [vmem:[#allocation5 + $0x54] sm:$0xf0]  ;;  %v1179_v51 = vor.u32 %v1417_v44, %v1176_v45  ;;  %v1158_v52 = vld [vmem:[#allocation5 + $0x148] sm:$0xf]  ;;  %v1381_v54 = vld [vmem:[#allocation5 + $0x4c] sm:$0xf] }
  0x42   :  { %611 = vmatpush.bf16.msrb.mxu2 %v1083_v18  ;;  %533 = vmatmul.bf16.vlgmr.msra.gmra.mxu0 %v1661_v32  ;;  %v1415_v53 = vld [vmem:[#allocation5 + $0x154] sm:$0xf0]  ;;  %v1032_v55 = vld [vmem:[#allocation5 + $0x58] sm:$0xf0]  ;;  %v1413_v56 = vld [vmem:[#allocation5 + $0x14c] sm:$0xf]  ;;  %v1031_v58 = vor.u32 %v1383_v49, %v1030_v48 }
  0x43   :  { %625 = vmatpush.bf16.msrb.mxu3 %v1211_v21  ;;  %561 = vmatmul.bf16.vlgmr.msra.gmra.mxu2 %v1661_v32  ;;  %v1160_v57 = vld [vmem:[#allocation5 + $0x158] sm:$0xf0]  ;;  %v1159_v59 = vor.u32 %v1415_v53, %v1158_v52  ;;  %v1014_v60 = vld [vmem:[#allocation5 + $0x28] sm:$0xf]  ;;  %v1379_v61 = vld [vmem:[#allocation5 + $0x34] sm:$0xf0]  ;;  %v1035_v62 = vor.u32 %v1381_v54, %v1032_v55 }
  0x44   :  { %575 = vmatmul.bf16.vlgmr.msra.gmra.mxu3 %v1663_v33  ;;  %547 = vmatmul.bf16.vlgmr.msra.gmra.mxu1 %v1663_v33  ;;  %v1163_v63 = vor.u32 %v1413_v56, %v1160_v57  ;;  %v1142_v0 = vld [vmem:[#allocation5 + $0x128] sm:$0xf]  ;;  %v1411_v1 = vld [vmem:[#allocation5 + $0x134] sm:$0xf0]  ;;  %v1377_v2 = vld [vmem:[#allocation5 + $0x2c] sm:$0xf]  ;;  %v1015_v6 = vor.u32 %v1379_v61, %v1014_v60 }
  0x45   :  { %584 = vmatpush.bf16.msrb.mxu0 %v1063_v34  ;;  %598 = vmatpush.bf16.msrb.mxu1 %v1191_v35  ;;  %v1016_v3 = vld [vmem:[#allocation5 + $0x38] sm:$0xf0]  ;;  %v1409_v4 = vld [vmem:[#allocation5 + $0x12c] sm:$0xf]  ;;  %v1143_v7 = vor.u32 %v1411_v1, %v1142_v0  ;;  %v998_v8 = vld [vmem:[#allocation5 + $0x8] sm:$0xf] }
  0x46   :  { %612 = vmatpush.bf16.msrb.mxu2 %v1067_v38  ;;  %v1144_v5 = vld [vmem:[#allocation5 + $0x138] sm:$0xf0]  ;;  %v1375_v9 = vld [vmem:[#allocation5 + $0x14] sm:$0xf0]  ;;  %v1019_v10 = vor.u32 %v1377_v2, %v1016_v3  ;;  %v1126_v12 = vld [vmem:[#allocation5 + $0x108] sm:$0xf] }
  0x47   :  { %626 = vmatpush.bf16.msrb.mxu3 %v1195_v39  ;;  %v1147_v11 = vor.u32 %v1409_v4, %v1144_v5  ;;  %v1407_v13 = vld [vmem:[#allocation5 + $0x114] sm:$0xf0]  ;;  %v1373_v14 = vld [vmem:[#allocation5 + $0xc] sm:$0xf]  ;;  %v1000_v15 = vld [vmem:[#allocation5 + $0x18] sm:$0xf0]  ;;  %v999_v18 = vor.u32 %v1375_v9, %v998_v8 }
  0x48   :  { %v1405_v16 = vld [vmem:[#allocation5 + $0x10c] sm:$0xf]  ;;  %v1128_v17 = vld [vmem:[#allocation5 + $0x118] sm:$0xf0]  ;;  %v1127_v19 = vor.u32 %v1407_v13, %v1126_v12  ;;  %v1003_v20 = vor.u32 %v1373_v14, %v1000_v15  ;;  %v1442_v24 = vld [vmem:[#allocation8 + $0x30] sm:$0xff] }
  0x49   :  { %585 = vmatpush.bf16.msrb.mxu0 %v1047_v46  ;;  %599 = vmatpush.bf16.msrb.mxu1 %v1175_v47  ;;  %v1131_v21 = vor.u32 %v1405_v16, %v1128_v17  ;;  %v1443_v22 = vld [vmem:[#allocation8 + $0x38] sm:$0xff]  ;;  %v1450_v25 = vld [vmem:[#allocation8 + $0x70] sm:$0xff]  ;;  %v1441_v26 = vld [vmem:[#allocation8 + $0x28] sm:$0xff] }
  0x4a   :  { %613 = vmatpush.bf16.msrb.mxu2 %v1051_v50  ;;  %v1451_v23 = vld [vmem:[#allocation8 + $0x78] sm:$0xff]  ;;  %v1449_v27 = vld [vmem:[#allocation8 + $0x68] sm:$0xff]  ;;  %v1440_v28 = vld [vmem:[#allocation8 + $0x20] sm:$0xff] }
  0x4b   :  { %627 = vmatpush.bf16.msrb.mxu3 %v1179_v51  ;;  %v1439_v29 = vld [vmem:[#allocation8 + $0x18] sm:$0xff]  ;;  %v1448_v30 = vld [vmem:[#allocation8 + $0x60] sm:$0xff]  ;;  %v1438_v31 = vld [vmem:[#allocation8 + $0x10] sm:$0xff] }
  0x4c   :  { %v1447_v34 = vld [vmem:[#allocation8 + $0x58] sm:$0xff]  ;;  %v1437_v35 = vld [vmem:[#allocation8 + $0x8] sm:$0xff]  ;;  %v1458_v38 = vld [vmem:[#allocation8 + $0xb0] sm:$0xff] }
  0x4d   :  { %586 = vmatpush.bf16.msrb.mxu0 %v1031_v58  ;;  %600 = vmatpush.bf16.msrb.mxu1 %v1159_v59  ;;  %v1459_v36 = vld [vmem:[#allocation8 + $0xb8] sm:$0xff]  ;;  %v1445_v37 = vld [vmem:[#allocation8 + $0x48] sm:$0xff]  ;;  %v1444_v39 = vld [vmem:[#allocation8 + $0x40] sm:$0xff] }
  0x4e   :  { %614 = vmatpush.bf16.msrb.mxu2 %v1035_v62  ;;  %v1467_v40 = vld [vmem:[#allocation8 + $0xf8] sm:$0xff]  ;;  %v1457_v41 = vld [vmem:[#allocation8 + $0xa8] sm:$0xff]  ;;  %v1466_v42 = vld [vmem:[#allocation8 + $0xf0] sm:$0xff] }
  0x4f   :  { %628 = vmatpush.bf16.msrb.mxu3 %v1163_v63  ;;  %v1456_v43 = vld [vmem:[#allocation8 + $0xa0] sm:$0xff]  ;;  %v1465_v44 = vld [vmem:[#allocation8 + $0xe8] sm:$0xff]  ;;  %v1455_v45 = vld [vmem:[#allocation8 + $0x98] sm:$0xff] }
  0x50   :  { %v1673_v46 = vld [vmem:[#allocation7] sm:$0xf]  ;;  %v1464_v47 = vld [vmem:[#allocation8 + $0xe0] sm:$0xff]  ;;  %v1454_v51 = vld [vmem:[#allocation8 + $0x90] sm:$0xff] }
  0x51   :  { %587 = vmatpush.bf16.msrb.mxu0 %v1015_v6  ;;  %601 = vmatpush.bf16.msrb.mxu1 %v1143_v7  ;;  %v197_v48 = vperm.slane %v1673_v46, 0  ;;  %v1463_v53 = vld [vmem:[#allocation8 + $0xd8] sm:$0xff]  ;;  %v1453_v54 = vld [vmem:[#allocation8 + $0x88] sm:$0xff]  ;;  %v198_v55 = vperm.slane %v1673_v46, 1  ;;  %v1462_v56 = vld [vmem:[#allocation8 + $0xd0] sm:$0xff]  ;;  %v199_v17 = vperm.slane %v1673_v46, 2 }
  0x52   :  { %615 = vmatpush.bf16.msrb.mxu2 %v1019_v10  ;;  %v1452_v0 = vld [vmem:[#allocation8 + $0x80] sm:$0xff]  ;;  %v1461_v3 = vld [vmem:[#allocation8 + $0xc8] sm:$0xff] }
  0x53   :  { %629 = vmatpush.bf16.msrb.mxu3 %v1147_v11  ;;  %v1460_v6 = vld [vmem:[#allocation8 + $0xc0] sm:$0xff] }
  0x55   :  { %588 = vmatpush.bf16.msrb.mxu0 %v999_v18  ;;  %602 = vmatpush.bf16.msrb.mxu1 %v1127_v19 }
  0x56   :  { %616 = vmatpush.bf16.msrb.mxu2 %v1003_v20 }
  0x57   :  { %630 = vmatpush.bf16.msrb.mxu3 %v1131_v21  ;;  %v200_v21 = vperm.slane %v1673_v46, 3 }
  0x58   :  { %589 = vmatmul.bf16.vlgmr.msrb.gmra.mxu0 %v1661_v32  ;;  %603 = vmatmul.bf16.vlgmr.msrb.gmra.mxu1 %v1663_v33 }
  0x59   :  { %909 = vmatpush.bf16.msra.mxu0 %v1443_v22  ;;  %923 = vmatpush.bf16.msra.mxu1 %v1451_v23 }
  0x5a   :  { %617 = vmatmul.bf16.vlgmr.msrb.gmra.mxu2 %v1661_v32  ;;  %631 = vmatmul.bf16.vlgmr.msrb.gmra.mxu3 %v1663_v33  ;;  %v1446_v32 = vld [vmem:[#allocation8 + $0x50] sm:$0xff]  ;;  %v1436_v33 = vld [vmem:[#allocation8] sm:$0xff] }
  0x5b   :  { %937 = vmatpush.bf16.msra.mxu2 %v1459_v36  ;;  %951 = vmatpush.bf16.msra.mxu3 %v1467_v40 }
  0x5d   :  { %910 = vmatpush.bf16.msra.mxu0 %v1442_v24  ;;  %924 = vmatpush.bf16.msra.mxu1 %v1450_v25 }
  0x5f   :  { %938 = vmatpush.bf16.msra.mxu2 %v1458_v38  ;;  %952 = vmatpush.bf16.msra.mxu3 %v1466_v42 }
  0x61   :  { %911 = vmatpush.bf16.msra.mxu0 %v1441_v26  ;;  %925 = vmatpush.bf16.msra.mxu1 %v1449_v27 }
  0x63   :  { %939 = vmatpush.bf16.msra.mxu2 %v1457_v41  ;;  %953 = vmatpush.bf16.msra.mxu3 %v1465_v44 }
  0x65   :  { %912 = vmatpush.bf16.msra.mxu0 %v1440_v28  ;;  %926 = vmatpush.bf16.msra.mxu1 %v1448_v30 }
  0x67   :  { %940 = vmatpush.bf16.msra.mxu2 %v1456_v43  ;;  %954 = vmatpush.bf16.msra.mxu3 %v1464_v47 }
  0x69   :  { %913 = vmatpush.bf16.msra.mxu0 %v1439_v29  ;;  %927 = vmatpush.bf16.msra.mxu1 %v1447_v34 }
  0x6b   :  { %941 = vmatpush.bf16.msra.mxu2 %v1455_v45  ;;  %955 = vmatpush.bf16.msra.mxu3 %v1463_v53 }
  0x6d   :  { %914 = vmatpush.bf16.msra.mxu0 %v1438_v31  ;;  %928 = vmatpush.bf16.msra.mxu1 %v1446_v32 }
  0x6f   :  { %942 = vmatpush.bf16.msra.mxu2 %v1454_v51  ;;  %956 = vmatpush.bf16.msra.mxu3 %v1462_v56 }
  0x71   :  { %915 = vmatpush.bf16.msra.mxu0 %v1437_v35  ;;  %929 = vmatpush.bf16.msra.mxu1 %v1445_v37 }
  0x73   :  { %943 = vmatpush.bf16.msra.mxu2 %v1453_v54  ;;  %957 = vmatpush.bf16.msra.mxu3 %v1461_v3 }
  0x75   :  { %916 = vmatpush.bf16.msra.mxu0 %v1436_v33  ;;  %930 = vmatpush.bf16.msra.mxu1 %v1444_v39  ;;  %v1479_v39 = vld [vmem:[%s1689_s4] ss:$0 sm:$0xff] }
  0x77   :  { %944 = vmatpush.bf16.msra.mxu2 %v1452_v0  ;;  %958 = vmatpush.bf16.msra.mxu3 %v1460_v6 }
  0xbf   :  { %v534_v49 = vpop.f32.mrf.mxu0 }
  0xc0   :  { %v535_v52 = vadd.f32 %v534_v49, %v197_v48 }
  0xc1   :  { %v548_v50 = vpop.f32.mrf.mxu1 }
  0xc2   :  { %v549_v58 = vadd.f32 %v548_v50, %v535_v52 }
  0xc4   :  { %v637_v1 = vmax.f32 %v549_v58, 0.0 }
  0xc6   :  { %v562_v57 = vpop.f32.mrf.mxu2 }
  0xc7   :  { %v576_v59 = vpop.f32.mrf.mxu3  ;;  %v536_v60 = vpop.f32.mrf.mxu0  ;;  %v563_v61 = vadd.f32 %v562_v57, %v198_v55 }
  0xc8   :  { %v537_v62 = vadd.f32 %v536_v60, %v197_v48 }
  0xc9   :  { %v550_v63 = vpop.f32.mrf.mxu1  ;;  %v577_v4 = vadd.f32 %v576_v59, %v563_v61 }
  0xca   :  { %v551_v2 = vadd.f32 %v550_v63, %v537_v62 }
  0xcb   :  { %v638_v11 = vmax.f32 %v577_v4, 0.0 }
  0xcc   :  { %v641_v5 = vmax.f32 %v551_v2, 0.0 }
  0xce   :  { %v564_v7 = vpop.f32.mrf.mxu2  ;;  %v645_v8 = vpack.c.bf16 %v641_v5, %v637_v1 }
  0xcf   :  { %v565_v9 = vadd.f32 %v564_v7, %v198_v55  ;;  %v578_v10 = vpop.f32.mrf.mxu3 }
  0xd0   :  { %917 = vmatmul.bf16.vlgmr.msra.gmra.mxu0 %v645_v8 }
  0xd1   :  { %v579_v12 = vadd.f32 %v578_v10, %v565_v9 }
  0xd3   :  { %v642_v13 = vmax.f32 %v579_v12, 0.0 }
  0xd5   :  { %v646_v14 = vpack.c.bf16 %v642_v13, %v638_v11  ;;  %v590_v15 = vpop.f32.mrf.mxu0  ;;  %v604_v16 = vpop.f32.mrf.mxu1 }
  0xd6   :  { %v591_v18 = vadd.f32 %v590_v15, %v199_v17 }
  0xd7   :  { %931 = vmatmul.bf16.vlgmr.msra.gmra.mxu1 %v646_v14 }
  0xd8   :  { %v605_v23 = vadd.f32 %v604_v16, %v591_v18 }
  0xda   :  { %v639_v28 = vmax.f32 %v605_v23, 0.0 }
  0xdd   :  { %v618_v19 = vpop.f32.mrf.mxu2  ;;  %v632_v20 = vpop.f32.mrf.mxu3 }
  0xde   :  { %v592_v22 = vpop.f32.mrf.mxu0  ;;  %v606_v25 = vpop.f32.mrf.mxu1  ;;  %v619_v27 = vadd.f32 %v618_v19, %v200_v21 }
  0xdf   :  { %v593_v24 = vadd.f32 %v592_v22, %v199_v17 }
  0xe0   :  { %v633_v34 = vadd.f32 %v632_v20, %v619_v27 }
  0xe1   :  { %v607_v26 = vadd.f32 %v606_v25, %v593_v24 }
  0xe2   :  { %v640_v36 = vmax.f32 %v633_v34, 0.0 }
  0xe3   :  { %v643_v29 = vmax.f32 %v607_v26, 0.0 }
  0xe5   :  { %v647_v30 = vpack.c.bf16 %v643_v29, %v639_v28  ;;  %v620_v31 = vpop.f32.mrf.mxu2  ;;  %v634_v32 = vpop.f32.mrf.mxu3 }
  0xe6   :  { %v621_v35 = vadd.f32 %v620_v31, %v200_v21 }
  0xe7   :  { %945 = vmatmul.bf16.vlgmr.msra.gmra.mxu2 %v647_v30 }
  0xe8   :  { %v635_v33 = vadd.f32 %v634_v32, %v621_v35 }
  0xea   :  { %v644_v37 = vmax.f32 %v635_v33, 0.0 }
  0xec   :  { %v648_v38 = vpack.c.bf16 %v644_v37, %v640_v36 }
  0xee   :  { %959 = vmatmul.bf16.vlgmr.msra.gmra.mxu3 %v648_v38 }
 0x14d   :  { %v918_v40 = vpop.f32.mrf.mxu0 }
 0x14e   :  { %v919_v42 = vadd.f32 %v1479_v39, %v918_v40 }
 0x154   :  { %v932_v41 = vpop.f32.mrf.mxu1 }
 0x155   :  { %v933_v44 = vadd.f32 %v932_v41, %v919_v42  ;;  %v920_v46 = vpop.f32.mrf.mxu0 }
 0x156   :  { %v921_v50 = vadd.f32 %v1479_v39, %v920_v46 }
 0x15c   :  { %v934_v49 = vpop.f32.mrf.mxu1 }
 0x15d   :  { %v935_v52 = vadd.f32 %v934_v49, %v921_v50 }
 0x16a   :  { %v946_v43 = vpop.f32.mrf.mxu2 }
 0x16b   :  { %v947_v45 = vadd.f32 %v946_v43, %v933_v44 }
 0x171   :  { %v960_v47 = vpop.f32.mrf.mxu3 }
 0x172   :  { %v961_v48 = vadd.f32 %v960_v47, %v947_v45  ;;  %v948_v51 = vpop.f32.mrf.mxu2 }
 0x173   :  { %v949_v53 = vadd.f32 %v948_v51, %v935_v52 }
 0x174   :  { %965 = vst [vmem:[#allocation10] sm:$0xff] %v961_v48 }
 0x179   :  { %v962_v54 = vpop.f32.mrf.mxu3 }
 0x17a   :  { %v963_v55 = vadd.f32 %v962_v54, %v949_v53 }
 0x17c   :  { %966 = vst [vmem:[#allocation10 + $0x8] sm:$0xff] %v963_v55 }
 0x17d   :  { %970 = vsyncadd [#allocation4], 224  ;;  %s973_s16 = sshll.u32 %s1690_s5, 4  ;;  %s1616_s17 = smov [#allocation10]   ;;  %s974_s16 = int_to_ptr.hbm [resolvable:$true] %s973_s16 }
 0x17e   :  { %s971_s18 = sshll.u32 %s1616_s17, 4  ;;  %s1617_s19 = smov 32   ;;  %s972_s18 = int_to_ptr.vmem [resolvable:$true] %s971_s18 }
 0x17f   :  { %s1618_s20 = smov 2  }
 0x180   :  { %979 = dma.vmem_to_hbm [thread:$0]  %s972_s18, 32, %s974_s16, [#allocation4], %s1617_s19, %s1617_s19, %s1618_s20  }
 0x181   :  { %1606 = dma.done.wait [#allocation4], 256  }
 0x182   :  { %1607 = vsyncadd [#allocation4], 4294967040 }
 0x183   :  { %984 = vsyncpa [#allocation3], 1 }
 0x184   :  { %985 = vsyncpa [#allocation6], 1 }
 0x185   :  { %986 = vsyncpa [#allocation9], 1 }
 0x186   :  { %987 = vsyncpa [#allocation4], 1 }

</bundles_post_ra>
